<compile_context>
chip_gen: v5e
topology: v5e:2x2
jax: 0.10.0
libtpu: 0.0.40
codegen_flags: <defaults>
</compile_context>

<pallas_src>
import functools

import jax
import jax.numpy as jnp
import numpy as np
from jax.experimental import pallas as pl
from jax.experimental.pallas import tpu as pltpu


def _round_up(x, m):
    return ((x + m - 1) // m) * m


def _pad_gate_cols(w, H, H_pad, G):
    """Pad each of the G gate blocks along the last axis from H to H_pad."""
    if H_pad == H:
        return w
    parts = []
    for g in range(G):
        blk = w[..., g * H:(g + 1) * H]
        pad = [(0, 0)] * (w.ndim - 1) + [(0, H_pad - H)]
        parts.append(jnp.pad(blk, pad))
    return jnp.concatenate(parts, axis=-1)


# ----------------------------------------------------------------------------
# Pallas kernel: single invocation, whole recurrence unrolled in the body.
# ----------------------------------------------------------------------------
def _chain_rnn_kernel(x_ref, wih_ref, whh_ref, b_ref, out_ref, *,
                      rnn_type, pooling, T, N, H_pad):
    # x_ref:   (T*N, D)        time-major input, rows t*N..(t+1)*N per step
    # wih_ref: (D, G*H_pad)    input->gates weight (pre-transposed, gate-padded)
    # whh_ref: (H_pad, G*H_pad) hidden->gates weight
    # b_ref:   (1, G*H_pad)    fused b_ih + b_hh
    # out_ref: (N, H_pad)

    # --- Prologue: one big MXU matmul for all timesteps (no seq. dependence).
    gx_all = (jnp.dot(x_ref[...], wih_ref[...],
                      preferred_element_type=jnp.float32)
              + b_ref[...])                                   # (T*N, G*H_pad)

    whh = whh_ref[...]                                        # hoisted load
    h = jnp.zeros((N, H_pad), jnp.float32)
    if rnn_type == 'LSTM':
        c = jnp.zeros((N, H_pad), jnp.float32)
    if pooling != 'last':
        acc = jnp.zeros((N, H_pad), jnp.float32)

    # --- Recurrence: fully unrolled (T small & static); only h @ W_hh is on
    #     the sequential critical path.  All slices are static & lane-aligned.
    for t in range(T):
        gates = gx_all[t * N:(t + 1) * N, :] + jnp.dot(
            h, whh, preferred_element_type=jnp.float32)       # (N, G*H_pad)
        if rnn_type == 'RNN':
            h = jnp.tanh(gates)
        else:  # LSTM, PyTorch gate order i, f, g, o (128-lane-aligned slices)
            i = jax.nn.sigmoid(gates[:, 0 * H_pad:1 * H_pad])
            f = jax.nn.sigmoid(gates[:, 1 * H_pad:2 * H_pad])
            g = jnp.tanh(gates[:, 2 * H_pad:3 * H_pad])
            o = jax.nn.sigmoid(gates[:, 3 * H_pad:4 * H_pad])
            c = f * c + i * g
            h = o * jnp.tanh(c)
        if pooling != 'last':
            acc = acc + h

    if pooling == 'last':
        out_ref[...] = h.astype(out_ref.dtype)
    else:  # mean over time: multiply by precomputed 1/T (no divide)
        out_ref[...] = (acc * (1.0 / T)).astype(out_ref.dtype)


def chain_rnn_pallas(combined_encs, wih_p, whh_p, bias_p, *,
                     rnn_type, pooling, out_length, hidden_pad):
    """combined_encs: (T, N, D) f32; padded weights (D, G*Hp), (Hp, G*Hp), (1, G*Hp)."""
    T, N, D = combined_encs.shape
    H_pad = hidden_pad
    N_pad = _round_up(N, 8)                      # sublane alignment
    if N_pad != N:
        combined_encs = jnp.pad(combined_encs,
                                ((0, 0), (0, N_pad - N), (0, 0)))
    x2d = combined_encs.reshape(T * N_pad, D)    # free reshape (row-major)

    kernel = functools.partial(_chain_rnn_kernel, rnn_type=rnn_type,
                               pooling=pooling, T=T, N=N_pad, H_pad=H_pad)
    out_padded = pl.pallas_call(
        kernel,
        out_shape=jax.ShapeDtypeStruct((N_pad, H_pad), jnp.float32),
        in_specs=[
            pl.BlockSpec(memory_space=pltpu.MemorySpace.VMEM),  # x (whole)
            pl.BlockSpec(memory_space=pltpu.MemorySpace.VMEM),  # W_ih^T
            pl.BlockSpec(memory_space=pltpu.MemorySpace.VMEM),  # W_hh^T
            pl.BlockSpec(memory_space=pltpu.MemorySpace.VMEM),  # bias
        ],
        out_specs=pl.BlockSpec(memory_space=pltpu.MemorySpace.VMEM),
    )(x2d, wih_p, whh_p, bias_p)
    return out_padded[:N, :out_length]


# ----------------------------------------------------------------------------
# Module-equivalent wrapper (concat glue in plain JAX, recurrence in Pallas).
# ----------------------------------------------------------------------------
class CombinedConcatChainEncoderPallas:
    def __init__(self, v_feature_lengths, e_feature_lengths, out_length,
                 rnn_type, pooling, key):
        assert rnn_type in ('RNN', 'LSTM')
        self.rnn_type = rnn_type
        self.pooling = pooling
        self.out_length = out_length
        D = sum(v_feature_lengths) + sum(e_feature_lengths)
        H = out_length
        G = 1 if rnn_type == 'RNN' else 4
        k = 1.0 / np.sqrt(H)          # PyTorch default uniform(-1/sqrt(H), 1/sqrt(H))
        k1, k2, k3, k4 = jax.random.split(key, 4)
        # stored pre-transposed: x @ wih, h @ whh  (unpadded, for reference)
        self.wih = jax.random.uniform(k1, (D, G * H), jnp.float32, -k, k)
        self.whh = jax.random.uniform(k2, (H, G * H), jnp.float32, -k, k)
        b_ih = jax.random.uniform(k3, (G * H,), jnp.float32, -k, k)
        b_hh = jax.random.uniform(k4, (G * H,), jnp.float32, -k, k)
        self.bias = (b_ih + b_hh).reshape(1, G * H)

        # Lane-aligned copies for the kernel: each gate block padded H -> H_pad.
        H_pad = _round_up(H, 128)
        self.H_pad = H_pad
        self.wih_p = _pad_gate_cols(self.wih, H, H_pad, G)
        whh_rows = jnp.pad(self.whh, ((0, H_pad - H), (0, 0)))
        self.whh_p = _pad_gate_cols(whh_rows, H, H_pad, G)
        self.bias_p = _pad_gate_cols(self.bias, H, H_pad, G)

    @staticmethod
    def build_combined_encs(v_features, e_features):
        v_encs = [jnp.concatenate(feats, axis=1) for feats in v_features]
        e_encs = [jnp.concatenate(feats, axis=1) for feats in e_features]
        dummy_edge_enc = jnp.zeros(e_encs[0].shape, e_encs[0].dtype)
        e_encs = [dummy_edge_enc] + e_encs
        concat_encs = [jnp.concatenate([e_enc, v_enc], axis=1)
                       for v_enc, e_enc in zip(v_encs, e_encs)]
        return jnp.stack(concat_encs, axis=0)      # (T, N, D)

    def __call__(self, inputs):
        v_features, e_features = inputs
        combined_encs = self.build_combined_encs(v_features, e_features)
        return chain_rnn_pallas(combined_encs, self.wih_p, self.whh_p,
                                self.bias_p, rnn_type=self.rnn_type,
                                pooling=self.pooling,
                                out_length=self.out_length,
                                hidden_pad=self.H_pad)


# ----------------------------------------------------------------------------
# Pure-JAX reference (lax.scan, unpadded weights) for verification.
# ----------------------------------------------------------------------------
def reference_forward(x, wih, whh, bias, rnn_type, pooling):
    H = whh.shape[0]
    N = x.shape[1]

    def step(carry, xt):
        h, c = carry
        gates = xt @ wih + h @ whh + bias[0]
        if rnn_type == 'RNN':
            h = jnp.tanh(gates)
            return (h, c), h
        i = jax.nn.sigmoid(gates[:, :H])
        f = jax.nn.sigmoid(gates[:, H:2 * H])
        g = jnp.tanh(gates[:, 2 * H:3 * H])
        o = jax.nn.sigmoid(gates[:, 3 * H:])
        c = f * c + i * g
        h = o * jnp.tanh(c)
        return (h, c), h

    init = (jnp.zeros((N, H), jnp.float32), jnp.zeros((N, H), jnp.float32))
    _, outs = jax.lax.scan(step, init, x)
    return outs[-1] if pooling == 'last' else jnp.mean(outs, axis=0)


# ----------------------------------------------------------------------------
if __name__ == "__main__":
    key = jax.random.PRNGKey(0)
    v_feature_lengths = [6, 10]       # sum = 16
    e_feature_lengths = [8, 8]        # sum = 16  ->  D = 32
    out_length = 32                   # H
    num_vertices = 5                  # chain length T (=> num_edges = 4)
    batch = 4

    key, pkey = jax.random.split(key)

    # Build synthetic v_features / e_features (lists of tuples of (N, d) arrays).
    v_features = []
    for _ in range(num_vertices):
        feats = []
        for d in v_feature_lengths:
            key, sub = jax.random.split(key)
            feats.append(jax.random.normal(sub, (batch, d), jnp.float32))
        v_features.append(tuple(feats))
    e_features = []
    for _ in range(num_vertices - 1):
        feats = []
        for d in e_feature_lengths:
            key, sub = jax.random.split(key)
            feats.append(jax.random.normal(sub, (batch, d), jnp.float32))
        e_features.append(tuple(feats))

    ok = True
    for rnn_type in ('LSTM', 'RNN'):
        for pooling in ('last', 'mean'):
            enc = CombinedConcatChainEncoderPallas(
                v_feature_lengths, e_feature_lengths, out_length,
                rnn_type, pooling, pkey)
            out = enc((v_features, e_features))
            out = jax.block_until_ready(out)

            x = enc.build_combined_encs(v_features, e_features)
            ref = reference_forward(x, enc.wih, enc.whh, enc.bias,
                                    rnn_type, pooling)
            err = float(jnp.max(jnp.abs(out - ref)))
            if err > 1e-4 or out.shape != (batch, out_length):
                ok = False
                print(f"MISMATCH {rnn_type}/{pooling}: "
                      f"max abs err = {err}, shape = {out.shape}")

    if ok:
        print("KERNEL_OK")
</pallas_src>

<mosaic_0001>
module attributes {stable_mosaic.version = 11 : i64} {
  func.func @_chain_rnn_kernel(%arg0: memref<40x32xf32, #tpu.memory_space<vmem>>, %arg1: memref<32x512xf32, #tpu.memory_space<vmem>>, %arg2: memref<128x512xf32, #tpu.memory_space<vmem>>, %arg3: memref<1x512xf32, #tpu.memory_space<vmem>>, %arg4: memref<8x128xf32, #tpu.memory_space<vmem>>) attributes {dimension_semantics = [], scalar_prefetch = 0 : i64, scratch_operands = 0 : i64, tpu.core_type = #tpu.core_type<tc>} {
    %c0 = arith.constant 0 : index
    %c0_0 = arith.constant 0 : index
    %0 = vector.load %arg0[%c0, %c0_0] : memref<40x32xf32, #tpu.memory_space<vmem>>, vector<40x32xf32>
    %c0_1 = arith.constant 0 : index
    %c0_2 = arith.constant 0 : index
    %1 = vector.load %arg1[%c0_1, %c0_2] : memref<32x512xf32, #tpu.memory_space<vmem>>, vector<32x512xf32>
    %cst = arith.constant dense<0.000000e+00> : vector<40x512xf32>
    %2 = tpu.matmul %0, %1, %cst {dimension_numbers = #tpu.dot_dimension_numbers<[1], [0], [0], [1], [0, 0, 1, 1], [], []>} : vector<40x32xf32>, vector<32x512xf32>, vector<40x512xf32> -> vector<40x512xf32>
    %c0_3 = arith.constant 0 : index
    %c0_4 = arith.constant 0 : index
    %3 = vector.load %arg3[%c0_3, %c0_4] : memref<1x512xf32, #tpu.memory_space<vmem>>, vector<1x512xf32>
    %4 = vector.broadcast %3 : vector<1x512xf32> to vector<40x512xf32>
    %5 = arith.addf %2, %4 : vector<40x512xf32>
    %c0_5 = arith.constant 0 : index
    %c0_6 = arith.constant 0 : index
    %6 = vector.load %arg2[%c0_5, %c0_6] : memref<128x512xf32, #tpu.memory_space<vmem>>, vector<128x512xf32>
    %cst_7 = arith.constant 0.000000e+00 : f32
    %7 = vector.broadcast %cst_7 : f32 to vector<8x128xf32>
    %cst_8 = arith.constant 0.000000e+00 : f32
    %8 = vector.broadcast %cst_8 : f32 to vector<8x128xf32>
    %9 = vector.extract_strided_slice %5 {offsets = [0, 0], sizes = [8, 512], strides = [1, 1]} : vector<40x512xf32> to vector<8x512xf32>
    %cst_9 = arith.constant dense<0.000000e+00> : vector<8x512xf32>
    %10 = tpu.matmul %7, %6, %cst_9 {dimension_numbers = #tpu.dot_dimension_numbers<[1], [0], [0], [1], [0, 0, 1, 1], [], []>} : vector<8x128xf32>, vector<128x512xf32>, vector<8x512xf32> -> vector<8x512xf32>
    %11 = arith.addf %9, %10 : vector<8x512xf32>
    %12 = vector.extract_strided_slice %11 {offsets = [0, 0], sizes = [8, 128], strides = [1, 1]} : vector<8x512xf32> to vector<8x128xf32>
    %13 = arith.negf %12 : vector<8x128xf32>
    %14 = math.exp %13 : vector<8x128xf32>
    %cst_10 = arith.constant 1.000000e+00 : f32
    %15 = vector.broadcast %cst_10 : f32 to vector<8x128xf32>
    %16 = arith.addf %15, %14 : vector<8x128xf32>
    %17 = arith.divf %15, %16 : vector<8x128xf32>
    %18 = vector.extract_strided_slice %11 {offsets = [0, 128], sizes = [8, 128], strides = [1, 1]} : vector<8x512xf32> to vector<8x128xf32>
    %19 = arith.negf %18 : vector<8x128xf32>
    %20 = math.exp %19 : vector<8x128xf32>
    %cst_11 = arith.constant 1.000000e+00 : f32
    %21 = vector.broadcast %cst_11 : f32 to vector<8x128xf32>
    %22 = arith.addf %21, %20 : vector<8x128xf32>
    %23 = arith.divf %21, %22 : vector<8x128xf32>
    %24 = vector.extract_strided_slice %11 {offsets = [0, 256], sizes = [8, 128], strides = [1, 1]} : vector<8x512xf32> to vector<8x128xf32>
    %25 = math.tanh %24 : vector<8x128xf32>
    %26 = vector.extract_strided_slice %11 {offsets = [0, 384], sizes = [8, 128], strides = [1, 1]} : vector<8x512xf32> to vector<8x128xf32>
    %27 = arith.negf %26 : vector<8x128xf32>
    %28 = math.exp %27 : vector<8x128xf32>
    %cst_12 = arith.constant 1.000000e+00 : f32
    %29 = vector.broadcast %cst_12 : f32 to vector<8x128xf32>
    %30 = arith.addf %29, %28 : vector<8x128xf32>
    %31 = arith.divf %29, %30 : vector<8x128xf32>
    %32 = arith.mulf %23, %8 : vector<8x128xf32>
    %33 = arith.mulf %17, %25 : vector<8x128xf32>
    %34 = arith.addf %32, %33 : vector<8x128xf32>
    %35 = math.tanh %34 : vector<8x128xf32>
    %36 = arith.mulf %31, %35 : vector<8x128xf32>
    %37 = vector.extract_strided_slice %5 {offsets = [8, 0], sizes = [8, 512], strides = [1, 1]} : vector<40x512xf32> to vector<8x512xf32>
    %cst_13 = arith.constant dense<0.000000e+00> : vector<8x512xf32>
    %38 = tpu.matmul %36, %6, %cst_13 {dimension_numbers = #tpu.dot_dimension_numbers<[1], [0], [0], [1], [0, 0, 1, 1], [], []>} : vector<8x128xf32>, vector<128x512xf32>, vector<8x512xf32> -> vector<8x512xf32>
    %39 = arith.addf %37, %38 : vector<8x512xf32>
    %40 = vector.extract_strided_slice %39 {offsets = [0, 0], sizes = [8, 128], strides = [1, 1]} : vector<8x512xf32> to vector<8x128xf32>
    %41 = arith.negf %40 : vector<8x128xf32>
    %42 = math.exp %41 : vector<8x128xf32>
    %cst_14 = arith.constant 1.000000e+00 : f32
    %43 = vector.broadcast %cst_14 : f32 to vector<8x128xf32>
    %44 = arith.addf %43, %42 : vector<8x128xf32>
    %45 = arith.divf %43, %44 : vector<8x128xf32>
    %46 = vector.extract_strided_slice %39 {offsets = [0, 128], sizes = [8, 128], strides = [1, 1]} : vector<8x512xf32> to vector<8x128xf32>
    %47 = arith.negf %46 : vector<8x128xf32>
    %48 = math.exp %47 : vector<8x128xf32>
    %cst_15 = arith.constant 1.000000e+00 : f32
    %49 = vector.broadcast %cst_15 : f32 to vector<8x128xf32>
    %50 = arith.addf %49, %48 : vector<8x128xf32>
    %51 = arith.divf %49, %50 : vector<8x128xf32>
    %52 = vector.extract_strided_slice %39 {offsets = [0, 256], sizes = [8, 128], strides = [1, 1]} : vector<8x512xf32> to vector<8x128xf32>
    %53 = math.tanh %52 : vector<8x128xf32>
    %54 = vector.extract_strided_slice %39 {offsets = [0, 384], sizes = [8, 128], strides = [1, 1]} : vector<8x512xf32> to vector<8x128xf32>
    %55 = arith.negf %54 : vector<8x128xf32>
    %56 = math.exp %55 : vector<8x128xf32>
    %cst_16 = arith.constant 1.000000e+00 : f32
    %57 = vector.broadcast %cst_16 : f32 to vector<8x128xf32>
    %58 = arith.addf %57, %56 : vector<8x128xf32>
    %59 = arith.divf %57, %58 : vector<8x128xf32>
    %60 = arith.mulf %51, %34 : vector<8x128xf32>
    %61 = arith.mulf %45, %53 : vector<8x128xf32>
    %62 = arith.addf %60, %61 : vector<8x128xf32>
    %63 = math.tanh %62 : vector<8x128xf32>
    %64 = arith.mulf %59, %63 : vector<8x128xf32>
    %65 = vector.extract_strided_slice %5 {offsets = [16, 0], sizes = [8, 512], strides = [1, 1]} : vector<40x512xf32> to vector<8x512xf32>
    %cst_17 = arith.constant dense<0.000000e+00> : vector<8x512xf32>
    %66 = tpu.matmul %64, %6, %cst_17 {dimension_numbers = #tpu.dot_dimension_numbers<[1], [0], [0], [1], [0, 0, 1, 1], [], []>} : vector<8x128xf32>, vector<128x512xf32>, vector<8x512xf32> -> vector<8x512xf32>
    %67 = arith.addf %65, %66 : vector<8x512xf32>
    %68 = vector.extract_strided_slice %67 {offsets = [0, 0], sizes = [8, 128], strides = [1, 1]} : vector<8x512xf32> to vector<8x128xf32>
    %69 = arith.negf %68 : vector<8x128xf32>
    %70 = math.exp %69 : vector<8x128xf32>
    %cst_18 = arith.constant 1.000000e+00 : f32
    %71 = vector.broadcast %cst_18 : f32 to vector<8x128xf32>
    %72 = arith.addf %71, %70 : vector<8x128xf32>
    %73 = arith.divf %71, %72 : vector<8x128xf32>
    %74 = vector.extract_strided_slice %67 {offsets = [0, 128], sizes = [8, 128], strides = [1, 1]} : vector<8x512xf32> to vector<8x128xf32>
    %75 = arith.negf %74 : vector<8x128xf32>
    %76 = math.exp %75 : vector<8x128xf32>
    %cst_19 = arith.constant 1.000000e+00 : f32
    %77 = vector.broadcast %cst_19 : f32 to vector<8x128xf32>
    %78 = arith.addf %77, %76 : vector<8x128xf32>
    %79 = arith.divf %77, %78 : vector<8x128xf32>
    %80 = vector.extract_strided_slice %67 {offsets = [0, 256], sizes = [8, 128], strides = [1, 1]} : vector<8x512xf32> to vector<8x128xf32>
    %81 = math.tanh %80 : vector<8x128xf32>
    %82 = vector.extract_strided_slice %67 {offsets = [0, 384], sizes = [8, 128], strides = [1, 1]} : vector<8x512xf32> to vector<8x128xf32>
    %83 = arith.negf %82 : vector<8x128xf32>
    %84 = math.exp %83 : vector<8x128xf32>
    %cst_20 = arith.constant 1.000000e+00 : f32
    %85 = vector.broadcast %cst_20 : f32 to vector<8x128xf32>
    %86 = arith.addf %85, %84 : vector<8x128xf32>
    %87 = arith.divf %85, %86 : vector<8x128xf32>
    %88 = arith.mulf %79, %62 : vector<8x128xf32>
    %89 = arith.mulf %73, %81 : vector<8x128xf32>
    %90 = arith.addf %88, %89 : vector<8x128xf32>
    %91 = math.tanh %90 : vector<8x128xf32>
    %92 = arith.mulf %87, %91 : vector<8x128xf32>
    %93 = vector.extract_strided_slice %5 {offsets = [24, 0], sizes = [8, 512], strides = [1, 1]} : vector<40x512xf32> to vector<8x512xf32>
    %cst_21 = arith.constant dense<0.000000e+00> : vector<8x512xf32>
    %94 = tpu.matmul %92, %6, %cst_21 {dimension_numbers = #tpu.dot_dimension_numbers<[1], [0], [0], [1], [0, 0, 1, 1], [], []>} : vector<8x128xf32>, vector<128x512xf32>, vector<8x512xf32> -> vector<8x512xf32>
    %95 = arith.addf %93, %94 : vector<8x512xf32>
    %96 = vector.extract_strided_slice %95 {offsets = [0, 0], sizes = [8, 128], strides = [1, 1]} : vector<8x512xf32> to vector<8x128xf32>
    %97 = arith.negf %96 : vector<8x128xf32>
    %98 = math.exp %97 : vector<8x128xf32>
    %cst_22 = arith.constant 1.000000e+00 : f32
    %99 = vector.broadcast %cst_22 : f32 to vector<8x128xf32>
    %100 = arith.addf %99, %98 : vector<8x128xf32>
    %101 = arith.divf %99, %100 : vector<8x128xf32>
    %102 = vector.extract_strided_slice %95 {offsets = [0, 128], sizes = [8, 128], strides = [1, 1]} : vector<8x512xf32> to vector<8x128xf32>
    %103 = arith.negf %102 : vector<8x128xf32>
    %104 = math.exp %103 : vector<8x128xf32>
    %cst_23 = arith.constant 1.000000e+00 : f32
    %105 = vector.broadcast %cst_23 : f32 to vector<8x128xf32>
    %106 = arith.addf %105, %104 : vector<8x128xf32>
    %107 = arith.divf %105, %106 : vector<8x128xf32>
    %108 = vector.extract_strided_slice %95 {offsets = [0, 256], sizes = [8, 128], strides = [1, 1]} : vector<8x512xf32> to vector<8x128xf32>
    %109 = math.tanh %108 : vector<8x128xf32>
    %110 = vector.extract_strided_slice %95 {offsets = [0, 384], sizes = [8, 128], strides = [1, 1]} : vector<8x512xf32> to vector<8x128xf32>
    %111 = arith.negf %110 : vector<8x128xf32>
    %112 = math.exp %111 : vector<8x128xf32>
    %cst_24 = arith.constant 1.000000e+00 : f32
    %113 = vector.broadcast %cst_24 : f32 to vector<8x128xf32>
    %114 = arith.addf %113, %112 : vector<8x128xf32>
    %115 = arith.divf %113, %114 : vector<8x128xf32>
    %116 = arith.mulf %107, %90 : vector<8x128xf32>
    %117 = arith.mulf %101, %109 : vector<8x128xf32>
    %118 = arith.addf %116, %117 : vector<8x128xf32>
    %119 = math.tanh %118 : vector<8x128xf32>
    %120 = arith.mulf %115, %119 : vector<8x128xf32>
    %121 = vector.extract_strided_slice %5 {offsets = [32, 0], sizes = [8, 512], strides = [1, 1]} : vector<40x512xf32> to vector<8x512xf32>
    %cst_25 = arith.constant dense<0.000000e+00> : vector<8x512xf32>
    %122 = tpu.matmul %120, %6, %cst_25 {dimension_numbers = #tpu.dot_dimension_numbers<[1], [0], [0], [1], [0, 0, 1, 1], [], []>} : vector<8x128xf32>, vector<128x512xf32>, vector<8x512xf32> -> vector<8x512xf32>
    %123 = arith.addf %121, %122 : vector<8x512xf32>
    %124 = vector.extract_strided_slice %123 {offsets = [0, 0], sizes = [8, 128], strides = [1, 1]} : vector<8x512xf32> to vector<8x128xf32>
    %125 = arith.negf %124 : vector<8x128xf32>
    %126 = math.exp %125 : vector<8x128xf32>
    %cst_26 = arith.constant 1.000000e+00 : f32
    %127 = vector.broadcast %cst_26 : f32 to vector<8x128xf32>
    %128 = arith.addf %127, %126 : vector<8x128xf32>
    %129 = arith.divf %127, %128 : vector<8x128xf32>
    %130 = vector.extract_strided_slice %123 {offsets = [0, 128], sizes = [8, 128], strides = [1, 1]} : vector<8x512xf32> to vector<8x128xf32>
    %131 = arith.negf %130 : vector<8x128xf32>
    %132 = math.exp %131 : vector<8x128xf32>
    %cst_27 = arith.constant 1.000000e+00 : f32
    %133 = vector.broadcast %cst_27 : f32 to vector<8x128xf32>
    %134 = arith.addf %133, %132 : vector<8x128xf32>
    %135 = arith.divf %133, %134 : vector<8x128xf32>
    %136 = vector.extract_strided_slice %123 {offsets = [0, 256], sizes = [8, 128], strides = [1, 1]} : vector<8x512xf32> to vector<8x128xf32>
    %137 = math.tanh %136 : vector<8x128xf32>
    %138 = vector.extract_strided_slice %123 {offsets = [0, 384], sizes = [8, 128], strides = [1, 1]} : vector<8x512xf32> to vector<8x128xf32>
    %139 = arith.negf %138 : vector<8x128xf32>
    %140 = math.exp %139 : vector<8x128xf32>
    %cst_28 = arith.constant 1.000000e+00 : f32
    %141 = vector.broadcast %cst_28 : f32 to vector<8x128xf32>
    %142 = arith.addf %141, %140 : vector<8x128xf32>
    %143 = arith.divf %141, %142 : vector<8x128xf32>
    %144 = arith.mulf %135, %118 : vector<8x128xf32>
    %145 = arith.mulf %129, %137 : vector<8x128xf32>
    %146 = arith.addf %144, %145 : vector<8x128xf32>
    %147 = math.tanh %146 : vector<8x128xf32>
    %148 = arith.mulf %143, %147 : vector<8x128xf32>
    %c0_29 = arith.constant 0 : index
    %c0_30 = arith.constant 0 : index
    %149 = vector.load %arg4[%c0_29, %c0_30] : memref<8x128xf32, #tpu.memory_space<vmem>>, vector<8x128xf32>
    tpu.vector_store %arg4[%c0_29, %c0_30], %148 {strides = array<i32>} : memref<8x128xf32, #tpu.memory_space<vmem>>, vector<8x128xf32>,
    return
  }
}

</mosaic_0001>

<bundles_post_ra>
// kernel: tpu_custom_call.1
= control target key start
LH: loop header
LB: loop body
LE: loop exit
PB: predicated region body
PF: predicated region fallthrough
CT: control target
= control target key end

     0   :  { %9 = vsyncpa [#allocation3], 0  ;;  %s1832_s0 = inlined_call_operand.vmem [shape: f32[40,32], index: 0, kind: input, shape index: {}]   ;;  %s1833_s1 = inlined_call_operand.hbm [shape: f32[32,512], index: 1, kind: input, shape index: {}]   ;;  %s1834_s2 = inlined_call_operand.hbm [shape: f32[128,512], index: 2, kind: input, shape index: {}]   ;;  %s1835_s3 = inlined_call_operand.vmem [shape: f32[1,512], index: 3, kind: input, shape index: {}]   ;;  %s1836_s4 = inlined_call_operand.hbm [shape: f32[8,128], index: 4, kind: output, shape index: {}]  }
   0x1   :  { %10 = vsyncpa [#allocation6], 0 }
   0x2   :  { %11 = vsyncpa [#allocation4], 0  ;;  %s18_s17 = sshll.u32 %s1833_s1, 4  ;;  %s1270_s18 = smov [#allocation2]   ;;  %s19_s17 = int_to_ptr.hbm [resolvable:$true] %s18_s17 }
   0x3   :  { %s20_s19 = sshll.u32 %s1270_s18, 4  ;;  %s31_s22 = sshll.u32 %s1834_s2, 4  ;;  %s21_s19 = int_to_ptr.vmem [resolvable:$true] %s20_s19  ;;  %s32_s22 = int_to_ptr.hbm [resolvable:$true] %s31_s22 }
   0x4   :  { %s1271_s23 = smov 512   ;;  %s1272_s24 = smov 32  }
   0x5   :  { %26 = dma.hbm_to_vmem [thread:$0]  %s19_s17, 2048, %s21_s19, [#allocation3], %s1271_s23, %s1271_s23, %s1272_s24  }
   0x6   :  { %s1273_s25 = smov [#allocation5]  }
   0x7   :  { %s33_s26 = sshll.u32 %s1273_s25, 4  ;;  %s34_s26 = int_to_ptr.vmem [resolvable:$true] %s33_s26 }
   0x8   :  { %39 = dma.hbm_to_vmem [thread:$0]  %s32_s22, 8192, %s34_s26, [#allocation6], %s1271_s23, %s1271_s23, %s1272_s24  }
   0x9   :  { %1264 = dma.done.wait [#allocation3], 2048  }
   0xa   :  { %1265 = vsyncadd [#allocation3], 4294965248 }
   0xb   :  { %1266 = dma.done.wait [#allocation6], 8192  }
   0xc   :  { %1267 = vsyncadd [#allocation6], 4294959104  ;;  %v67_v0 = vld [vmem:[#allocation2 + $0x60] sm:$0xff]  ;;  %v68_v1 = vld [vmem:[#allocation2 + $0x68] sm:$0xff]  ;;  %vm81_vm0 = vcmask 261120   ;;  %s1032_s13 = sshll.u32 %s1836_s4, 4  ;;  %s1033_s13 = int_to_ptr.hbm [resolvable:$true] %s1032_s13 }
   0xd   :  { %v69_v2 = vld [vmem:[#allocation2 + $0x70] sm:$0xff]  ;;  %109 = vmatpush.msra.mxu0 %v67_v0  ;;  %141 = vmatpush.msra.mxu1 %v68_v1  ;;  %v70_v3 = vld [vmem:[#allocation2 + $0x78] sm:$0xff]  ;;  %v63_v4 = vld [vmem:[#allocation2 + $0x40] sm:$0xff] }
   0xe   :  { %v64_v5 = vld [vmem:[#allocation2 + $0x48] sm:$0xff]  ;;  %173 = vmatpush.msra.mxu2 %v69_v2  ;;  %205 = vmatpush.msra.mxu3 %v70_v3  ;;  %v65_v6 = vld [vmem:[#allocation2 + $0x50] sm:$0xff]  ;;  %v66_v7 = vld [vmem:[#allocation2 + $0x58] sm:$0xff] }
   0xf   :  { %v59_v8 = vld [vmem:[#allocation2 + $0x20] sm:$0xff]  ;;  %110 = vmatpush.msra.mxu0 %v63_v4  ;;  %142 = vmatpush.msra.mxu1 %v64_v5  ;;  %v60_v9 = vld [vmem:[#allocation2 + $0x28] sm:$0xff]  ;;  %v61_v10 = vld [vmem:[#allocation2 + $0x30] sm:$0xff] }
  0x10   :  { %v62_v11 = vld [vmem:[#allocation2 + $0x38] sm:$0xff]  ;;  %174 = vmatpush.msra.mxu2 %v65_v6  ;;  %206 = vmatpush.msra.mxu3 %v66_v7  ;;  %v55_v12 = vld [vmem:[#allocation2] sm:$0xff]  ;;  %v56_v13 = vld [vmem:[#allocation2 + $0x8] sm:$0xff] }
  0x11   :  { %111 = vmatpush.msra.mxu0 %v59_v8  ;;  %143 = vmatpush.msra.mxu1 %v60_v9  ;;  %v57_v14 = vld [vmem:[#allocation2 + $0x10] sm:$0xff]  ;;  %v58_v15 = vld [vmem:[#allocation2 + $0x18] sm:$0xff]  ;;  %v50_v16 = vld [vmem:[%s1832_s0] sm:$0xff] }
  0x12   :  { %175 = vmatpush.msra.mxu2 %v61_v10  ;;  %207 = vmatpush.msra.mxu3 %v62_v11  ;;  %v1310_v17 = vld [vmem:[#allocation5 + $0x1e0] sm:$0xff]  ;;  %v1312_v18 = vld [vmem:[#allocation5 + $0x1e8] sm:$0xff]  ;;  %v1316_v19 = vld [vmem:[#allocation5 + $0x1f8] sm:$0xff] }
  0x13   :  { %112 = vmatpush.msra.mxu0 %v55_v12  ;;  %144 = vmatpush.msra.mxu1 %v56_v13  ;;  %v1318_v20 = vld [vmem:[#allocation5 + $0x1f0] sm:$0xff]  ;;  %v1322_v21 = vld [vmem:[#allocation5 + $0x1c0] sm:$0xff]  ;;  %v1324_v22 = vld [vmem:[#allocation5 + $0x1c8] sm:$0xff] }
  0x14   :  { %176 = vmatpush.msra.mxu2 %v57_v14  ;;  %208 = vmatpush.msra.mxu3 %v58_v15  ;;  %v1328_v23 = vld [vmem:[#allocation5 + $0x1d8] sm:$0xff]  ;;  %v1330_v24 = vld [vmem:[#allocation5 + $0x1d0] sm:$0xff]  ;;  %v1332_v25 = vld [vmem:[#allocation5 + $0x1a0] sm:$0xff] }
  0x15   :  { %1043 = vmatmul.msk.f32.vlgmr.msra.gmra.mxu0 %vm81_vm0, %v50_v16  ;;  %1048 = vmatmul.msk.f32.vlgmr.msra.gmra.mxu1 %vm81_vm0, %v50_v16  ;;  %v1334_v26 = vld [vmem:[#allocation5 + $0x1a8] sm:$0xff]  ;;  %v1340_v27 = vld [vmem:[#allocation5 + $0x1b8] sm:$0xff]  ;;  %v1342_v28 = vld [vmem:[#allocation5 + $0x1b0] sm:$0xff] }
  0x16   :  { %1053 = vmatmul.msk.f32.vlgmr.msra.gmra.mxu2 %vm81_vm0, %v50_v16  ;;  %1058 = vmatmul.msk.f32.vlgmr.msra.gmra.mxu3 %vm81_vm0, %v50_v16  ;;  %v51_v29 = vld [vmem:[%s1832_s0 + $0x8] sm:$0xff]  ;;  %v1351_v30 = vld [vmem:[#allocation5 + $0x180] sm:$0xff]  ;;  %v1359_v32 = vld [vmem:[#allocation5 + $0x198] sm:$0xff] }
  0x17   :  { %289 = vmatpush.msrb.mxu0 %v1310_v17  ;;  %309 = vmatpush.msrb.mxu1 %v1312_v18  ;;  %v1353_v31 = vld [vmem:[#allocation5 + $0x188] sm:$0xff]  ;;  %v1361_v33 = vld [vmem:[#allocation5 + $0x190] sm:$0xff]  ;;  %v1365_v34 = vld [vmem:[#allocation5 + $0x160] sm:$0xff] }
  0x18   :  { %349 = vmatpush.msrb.mxu3 %v1316_v19  ;;  %329 = vmatpush.msrb.mxu2 %v1318_v20  ;;  %v1367_v35 = vld [vmem:[#allocation5 + $0x168] sm:$0xff]  ;;  %v1371_v36 = vld [vmem:[#allocation5 + $0x178] sm:$0xff]  ;;  %v1373_v37 = vld [vmem:[#allocation5 + $0x170] sm:$0xff] }
  0x19   :  { %290 = vmatpush.msrb.mxu0 %v1322_v21  ;;  %310 = vmatpush.msrb.mxu1 %v1324_v22  ;;  %v1375_v38 = vld [vmem:[#allocation5 + $0x140] sm:$0xff]  ;;  %v1377_v39 = vld [vmem:[#allocation5 + $0x148] sm:$0xff]  ;;  %v1383_v40 = vld [vmem:[#allocation5 + $0x158] sm:$0xff] }
  0x1a   :  { %350 = vmatpush.msrb.mxu3 %v1328_v23  ;;  %330 = vmatpush.msrb.mxu2 %v1330_v24  ;;  %v1385_v41 = vld [vmem:[#allocation5 + $0x150] sm:$0xff]  ;;  %v1387_v42 = vld [vmem:[#allocation5 + $0x120] sm:$0xff]  ;;  %v1389_v43 = vld [vmem:[#allocation5 + $0x128] sm:$0xff] }
  0x1b   :  { %291 = vmatpush.msrb.mxu0 %v1332_v25  ;;  %311 = vmatpush.msrb.mxu1 %v1334_v26  ;;  %v52_v44 = vld [vmem:[%s1832_s0 + $0x10] sm:$0xff]  ;;  %v1402_v45 = vld [vmem:[#allocation5 + $0x100] sm:$0xff]  ;;  %v1404_v46 = vld [vmem:[#allocation5 + $0x108] sm:$0xff] }
  0x1c   :  { %351 = vmatpush.msrb.mxu3 %v1340_v27  ;;  %331 = vmatpush.msrb.mxu2 %v1342_v28  ;;  %v1408_v47 = vld [vmem:[#allocation5 + $0x138] sm:$0xff]  ;;  %v1410_v48 = vld [vmem:[#allocation5 + $0x130] sm:$0xff]  ;;  %v1414_v49 = vld [vmem:[#allocation5 + $0xe0] sm:$0xff] }
  0x1d   :  { %1044 = vmatmul.msk.f32.gmra.mxu0 %vm81_vm0, %v51_v29  ;;  %1049 = vmatmul.msk.f32.gmra.mxu1 %vm81_vm0, %v51_v29  ;;  %v1416_v50 = vld [vmem:[#allocation5 + $0xe8] sm:$0xff]  ;;  %v1420_v51 = vld [vmem:[#allocation5 + $0x110] sm:$0xff]  ;;  %v1422_v52 = vld [vmem:[#allocation5 + $0x118] sm:$0xff] }
  0x1e   :  { %1054 = vmatmul.msk.f32.gmra.mxu2 %vm81_vm0, %v51_v29  ;;  %1059 = vmatmul.msk.f32.gmra.mxu3 %vm81_vm0, %v51_v29  ;;  %v1426_v53 = vld [vmem:[#allocation5 + $0xc0] sm:$0xff]  ;;  %v1428_v54 = vld [vmem:[#allocation5 + $0xc8] sm:$0xff]  ;;  %v1432_v55 = vld [vmem:[#allocation5 + $0xf0] sm:$0xff] }
  0x1f   :  { %292 = vmatpush.msrb.mxu0 %v1351_v30  ;;  %312 = vmatpush.msrb.mxu1 %v1353_v31  ;;  %v1434_v56 = vld [vmem:[#allocation5 + $0xf8] sm:$0xff]  ;;  %v1443_v58 = vld [vmem:[#allocation5 + $0xa0] sm:$0xff]  ;;  %v1445_v59 = vld [vmem:[#allocation5 + $0xa8] sm:$0xff] }
  0x20   :  { %352 = vmatpush.msrb.mxu3 %v1359_v32  ;;  %332 = vmatpush.msrb.mxu2 %v1361_v33  ;;  %v53_v57 = vld [vmem:[%s1832_s0 + $0x18] sm:$0xff]  ;;  %1888 = vst [vmem:[#allocation11_spill] sm:$0xff] %v1443_v58  ;;  %v1451_v60 = vld [vmem:[#allocation5 + $0xd0] sm:$0xff]  ;;  %v1457_v62 = vld [vmem:[#allocation5 + $0x80] sm:$0xff] }
  0x21   :  { %293 = vmatpush.msrb.mxu0 %v1365_v34  ;;  %313 = vmatpush.msrb.mxu1 %v1367_v35  ;;  %1889 = vst [vmem:[#allocation12_spill] sm:$0xff] %v1445_v59  ;;  %v1453_v61 = vld [vmem:[#allocation5 + $0xd8] sm:$0xff]  ;;  %v1459_v63 = vld [vmem:[#allocation5 + $0x88] sm:$0xff]  ;;  %v1463_v0 = vld [vmem:[#allocation5 + $0xb0] sm:$0xff] }
  0x22   :  { %353 = vmatpush.msrb.mxu3 %v1371_v36  ;;  %333 = vmatpush.msrb.mxu2 %v1373_v37  ;;  %1890 = vst [vmem:[#allocation13_spill] sm:$0xff] %v1453_v61  ;;  %v1465_v1 = vld [vmem:[#allocation5 + $0xb8] sm:$0xff]  ;;  %v1469_v2 = vld [vmem:[#allocation5 + $0x60] sm:$0xff]  ;;  %v1471_v3 = vld [vmem:[#allocation5 + $0x68] sm:$0xff] }
  0x23   :  { %294 = vmatpush.msrb.mxu0 %v1375_v38  ;;  %314 = vmatpush.msrb.mxu1 %v1377_v39  ;;  %1891 = vst [vmem:[#allocation14_spill] sm:$0xff] %v1457_v62  ;;  %v1475_v4 = vld [vmem:[#allocation5 + $0x90] sm:$0xff]  ;;  %v1477_v5 = vld [vmem:[#allocation5 + $0x98] sm:$0xff]  ;;  %v54_v6 = vld [vmem:[%s1832_s0 + $0x20] sm:$0xff] }
  0x24   :  { %354 = vmatpush.msrb.mxu3 %v1383_v40  ;;  %334 = vmatpush.msrb.mxu2 %v1385_v41  ;;  %1892 = vst [vmem:[#allocation15_spill] sm:$0xff] %v1459_v63  ;;  %v1488_v7 = vld [vmem:[#allocation5 + $0x40] sm:$0xff]  ;;  %v1490_v8 = vld [vmem:[#allocation5 + $0x48] sm:$0xff]  ;;  %v1494_v9 = vld [vmem:[#allocation5 + $0x70] sm:$0xff] }
  0x25   :  { %295 = vmatpush.msrb.mxu0 %v1387_v42  ;;  %315 = vmatpush.msrb.mxu1 %v1389_v43  ;;  %1893 = vst [vmem:[#allocation16_spill] sm:$0xff] %v1463_v0  ;;  %v1496_v10 = vld [vmem:[#allocation5 + $0x78] sm:$0xff]  ;;  %v1500_v11 = vld [vmem:[#allocation5 + $0x20] sm:$0xff]  ;;  %v1502_v12 = vld [vmem:[#allocation5 + $0x28] sm:$0xff] }
  0x26   :  { %1045 = vmatmul.msk.f32.gmra.mxu0 %vm81_vm0, %v52_v44  ;;  %1050 = vmatmul.msk.f32.gmra.mxu1 %vm81_vm0, %v52_v44  ;;  %1894 = vst [vmem:[#allocation17_spill] sm:$0xff] %v1465_v1  ;;  %v1506_v13 = vld [vmem:[#allocation5 + $0x50] sm:$0xff]  ;;  %v1508_v14 = vld [vmem:[#allocation5 + $0x58] sm:$0xff]  ;;  %v1512_v15 = vld [vmem:[#allocation5] sm:$0xff] }
  0x27   :  { %1055 = vmatmul.msk.f32.gmra.mxu2 %vm81_vm0, %v52_v44  ;;  %1060 = vmatmul.msk.f32.gmra.mxu3 %vm81_vm0, %v52_v44  ;;  %1895 = vst [vmem:[#allocation18_spill] sm:$0xff] %v1469_v2  ;;  %v1514_v16 = vld [vmem:[#allocation5 + $0x8] sm:$0xff]  ;;  %v1518_v29 = vld [vmem:[#allocation5 + $0x30] sm:$0xff]  ;;  %v1520_v44 = vld [vmem:[#allocation5 + $0x38] sm:$0xff] }
  0x28   :  { %296 = vmatpush.msrb.mxu0 %v1402_v45  ;;  %316 = vmatpush.msrb.mxu1 %v1404_v46  ;;  %1896 = vst [vmem:[#allocation19_spill] sm:$0xff] %v1471_v3 }
  0x29   :  { %355 = vmatpush.msrb.mxu3 %v1408_v47  ;;  %335 = vmatpush.msrb.mxu2 %v1410_v48  ;;  %1897 = vst [vmem:[#allocation20_spill] sm:$0xff] %v1475_v4 }
  0x2a   :  { %297 = vmatpush.msrb.mxu0 %v1414_v49  ;;  %317 = vmatpush.msrb.mxu1 %v1416_v50  ;;  %1898 = vst [vmem:[#allocation21_spill] sm:$0xff] %v1477_v5 }
  0x2b   :  { %336 = vmatpush.msrb.mxu2 %v1420_v51  ;;  %356 = vmatpush.msrb.mxu3 %v1422_v52  ;;  %1899 = vst [vmem:[#allocation22_spill] sm:$0xff] %v1488_v7 }
  0x2c   :  { %298 = vmatpush.msrb.mxu0 %v1426_v53  ;;  %318 = vmatpush.msrb.mxu1 %v1428_v54  ;;  %1900 = vst [vmem:[#allocation23_spill] sm:$0xff] %v1490_v8 }
  0x2d   :  { %337 = vmatpush.msrb.mxu2 %v1432_v55  ;;  %357 = vmatpush.msrb.mxu3 %v1434_v56  ;;  %1901 = vst [vmem:[#allocation24_spill] sm:$0xff] %v1494_v9 }
  0x2e   :  { %1046 = vmatmul.msk.f32.gmra.mxu0 %vm81_vm0, %v53_v57  ;;  %1051 = vmatmul.msk.f32.gmra.mxu1 %vm81_vm0, %v53_v57  ;;  %1902 = vst [vmem:[#allocation25_spill] sm:$0xff] %v1496_v10 }
  0x2f   :  { %1056 = vmatmul.msk.f32.gmra.mxu2 %vm81_vm0, %v53_v57  ;;  %1061 = vmatmul.msk.f32.gmra.mxu3 %vm81_vm0, %v53_v57  ;;  %1903 = vst [vmem:[#allocation26_spill] sm:$0xff] %v1500_v11  ;;  %v1526_v57 = vld [vmem:[#allocation5 + $0x10] sm:$0xff] }
  0x30   :  { %299 = vmatpush.msrb.mxu0 %v1443_v58  ;;  %319 = vmatpush.msrb.mxu1 %v1445_v59  ;;  %1904 = vst [vmem:[#allocation27_spill] sm:$0xff] %v1502_v12 }
  0x31   :  { %338 = vmatpush.msrb.mxu2 %v1451_v60  ;;  %358 = vmatpush.msrb.mxu3 %v1453_v61  ;;  %1905 = vst [vmem:[#allocation28_spill] sm:$0xff] %v1506_v13 }
  0x32   :  { %300 = vmatpush.msrb.mxu0 %v1457_v62  ;;  %320 = vmatpush.msrb.mxu1 %v1459_v63  ;;  %1906 = vst [vmem:[#allocation29_spill] sm:$0xff] %v1508_v14 }
  0x33   :  { %339 = vmatpush.msrb.mxu2 %v1463_v0  ;;  %359 = vmatpush.msrb.mxu3 %v1465_v1  ;;  %1907 = vst [vmem:[#allocation30_spill] sm:$0xff] %v1512_v15 }
  0x34   :  { %301 = vmatpush.msrb.mxu0 %v1469_v2  ;;  %321 = vmatpush.msrb.mxu1 %v1471_v3  ;;  %1908 = vst [vmem:[#allocation31_spill] sm:$0xff] %v1514_v16 }
  0x35   :  { %340 = vmatpush.msrb.mxu2 %v1475_v4  ;;  %360 = vmatpush.msrb.mxu3 %v1477_v5  ;;  %1909 = vst [vmem:[#allocation32_spill] sm:$0xff] %v1518_v29 }
  0x36   :  { %1047 = vmatmul.msk.f32.gmra.mxu0 %vm81_vm0, %v54_v6  ;;  %1052 = vmatmul.msk.f32.gmra.mxu1 %vm81_vm0, %v54_v6  ;;  %1910 = vst [vmem:[#allocation33_spill] sm:$0xff] %v1520_v44 }
  0x37   :  { %1057 = vmatmul.msk.f32.gmra.mxu2 %vm81_vm0, %v54_v6  ;;  %1062 = vmatmul.msk.f32.gmra.mxu3 %vm81_vm0, %v54_v6  ;;  %1911 = vst [vmem:[#allocation34_spill] sm:$0xff] %v1526_v57  ;;  %v1528_v6 = vld [vmem:[#allocation5 + $0x18] sm:$0xff] }
  0x38   :  { %302 = vmatpush.msrb.mxu0 %v1488_v7  ;;  %322 = vmatpush.msrb.mxu1 %v1490_v8  ;;  %1912 = vst [vmem:[#allocation35_spill] sm:$0xff] %v1528_v6 }
  0x39   :  { %341 = vmatpush.msrb.mxu2 %v1494_v9  ;;  %361 = vmatpush.msrb.mxu3 %v1496_v10 }
  0x3a   :  { %303 = vmatpush.msrb.mxu0 %v1500_v11  ;;  %323 = vmatpush.msrb.mxu1 %v1502_v12  ;;  %v1274_v12 = vmov 0.0  }
  0x3b   :  { %342 = vmatpush.msrb.mxu2 %v1506_v13  ;;  %362 = vmatpush.msrb.mxu3 %v1508_v14 }
  0x3c   :  { %304 = vmatpush.msrb.mxu0 %v1512_v15  ;;  %324 = vmatpush.msrb.mxu1 %v1514_v16 }
  0x3d   :  { %343 = vmatpush.msrb.mxu2 %v1518_v29  ;;  %363 = vmatpush.msrb.mxu3 %v1520_v44 }
  0x3e   :  { %305 = vmatmul.f32.vlgmr.msrb.gmra.mxu0 %v1274_v12  ;;  %325 = vmatmul.f32.vlgmr.msrb.gmra.mxu1 %v1274_v12 }
  0x3f   :  { %344 = vmatpush.msrb.mxu2 %v1526_v57  ;;  %364 = vmatpush.msrb.mxu3 %v1528_v6 }
  0x40   :  { %345 = vmatmul.f32.vlgmr.msrb.gmra.mxu2 %v1274_v12  ;;  %365 = vmatmul.f32.vlgmr.msrb.gmra.mxu3 %v1274_v12  ;;  %v1913_v12 = vld [vmem:[#allocation27_spill] sm:$0xff] }
  0x41   :  { %436 = vmatpush.msra.mxu0 %v1310_v17  ;;  %456 = vmatpush.msra.mxu1 %v1312_v18 }
  0x42   :  { %476 = vmatpush.msra.mxu2 %v1318_v20  ;;  %496 = vmatpush.msra.mxu3 %v1316_v19 }
  0x43   :  { %437 = vmatpush.msra.mxu0 %v1322_v21  ;;  %457 = vmatpush.msra.mxu1 %v1324_v22 }
  0x44   :  { %477 = vmatpush.msra.mxu2 %v1330_v24  ;;  %497 = vmatpush.msra.mxu3 %v1328_v23 }
  0x45   :  { %438 = vmatpush.msra.mxu0 %v1332_v25  ;;  %458 = vmatpush.msra.mxu1 %v1334_v26 }
  0x46   :  { %478 = vmatpush.msra.mxu2 %v1342_v28  ;;  %498 = vmatpush.msra.mxu3 %v1340_v27 }
  0x47   :  { %439 = vmatpush.msra.mxu0 %v1351_v30  ;;  %459 = vmatpush.msra.mxu1 %v1353_v31 }
  0x48   :  { %479 = vmatpush.msra.mxu2 %v1361_v33  ;;  %499 = vmatpush.msra.mxu3 %v1359_v32 }
  0x49   :  { %440 = vmatpush.msra.mxu0 %v1365_v34  ;;  %460 = vmatpush.msra.mxu1 %v1367_v35 }
  0x4a   :  { %480 = vmatpush.msra.mxu2 %v1373_v37  ;;  %500 = vmatpush.msra.mxu3 %v1371_v36 }
  0x4b   :  { %441 = vmatpush.msra.mxu0 %v1375_v38  ;;  %461 = vmatpush.msra.mxu1 %v1377_v39 }
  0x4c   :  { %481 = vmatpush.msra.mxu2 %v1385_v41  ;;  %501 = vmatpush.msra.mxu3 %v1383_v40 }
  0x4d   :  { %442 = vmatpush.msra.mxu0 %v1387_v42  ;;  %462 = vmatpush.msra.mxu1 %v1389_v43 }
  0x4e   :  { %482 = vmatpush.msra.mxu2 %v1410_v48  ;;  %502 = vmatpush.msra.mxu3 %v1408_v47 }
  0x4f   :  { %443 = vmatpush.msra.mxu0 %v1402_v45  ;;  %463 = vmatpush.msra.mxu1 %v1404_v46 }
  0x50   :  { %483 = vmatpush.msra.mxu2 %v1420_v51  ;;  %503 = vmatpush.msra.mxu3 %v1422_v52 }
  0x51   :  { %444 = vmatpush.msra.mxu0 %v1414_v49  ;;  %464 = vmatpush.msra.mxu1 %v1416_v50 }
  0x52   :  { %484 = vmatpush.msra.mxu2 %v1432_v55  ;;  %504 = vmatpush.msra.mxu3 %v1434_v56 }
  0x53   :  { %445 = vmatpush.msra.mxu0 %v1426_v53  ;;  %465 = vmatpush.msra.mxu1 %v1428_v54 }
  0x54   :  { %485 = vmatpush.msra.mxu2 %v1451_v60  ;;  %505 = vmatpush.msra.mxu3 %v1453_v61 }
  0x55   :  { %446 = vmatpush.msra.mxu0 %v1443_v58  ;;  %466 = vmatpush.msra.mxu1 %v1445_v59 }
  0x56   :  { %486 = vmatpush.msra.mxu2 %v1463_v0  ;;  %506 = vmatpush.msra.mxu3 %v1465_v1 }
  0x57   :  { %447 = vmatpush.msra.mxu0 %v1457_v62  ;;  %467 = vmatpush.msra.mxu1 %v1459_v63 }
  0x58   :  { %487 = vmatpush.msra.mxu2 %v1475_v4  ;;  %507 = vmatpush.msra.mxu3 %v1477_v5 }
  0x59   :  { %448 = vmatpush.msra.mxu0 %v1469_v2  ;;  %468 = vmatpush.msra.mxu1 %v1471_v3 }
  0x5a   :  { %488 = vmatpush.msra.mxu2 %v1494_v9  ;;  %508 = vmatpush.msra.mxu3 %v1496_v10 }
  0x5b   :  { %449 = vmatpush.msra.mxu0 %v1488_v7  ;;  %469 = vmatpush.msra.mxu1 %v1490_v8 }
  0x5c   :  { %489 = vmatpush.msra.mxu2 %v1506_v13  ;;  %509 = vmatpush.msra.mxu3 %v1508_v14 }
  0x5d   :  { %450 = vmatpush.msra.mxu0 %v1500_v11  ;;  %470 = vmatpush.msra.mxu1 %v1913_v12 }
  0x5e   :  { %490 = vmatpush.msra.mxu2 %v1518_v29  ;;  %510 = vmatpush.msra.mxu3 %v1520_v44 }
  0x5f   :  { %451 = vmatpush.msra.mxu0 %v1512_v15  ;;  %471 = vmatpush.msra.mxu1 %v1514_v16 }
  0x60   :  { %491 = vmatpush.msra.mxu2 %v1526_v57  ;;  %511 = vmatpush.msra.mxu3 %v1528_v6 }
  0x61   :  { %583 = vmatpush.msrb.mxu0 %v1310_v17  ;;  %603 = vmatpush.msrb.mxu1 %v1312_v18 }
  0x62   :  { %623 = vmatpush.msrb.mxu2 %v1318_v20  ;;  %643 = vmatpush.msrb.mxu3 %v1316_v19 }
  0x63   :  { %584 = vmatpush.msrb.mxu0 %v1322_v21  ;;  %604 = vmatpush.msrb.mxu1 %v1324_v22 }
  0x64   :  { %624 = vmatpush.msrb.mxu2 %v1330_v24  ;;  %644 = vmatpush.msrb.mxu3 %v1328_v23 }
  0x65   :  { %585 = vmatpush.msrb.mxu0 %v1332_v25  ;;  %605 = vmatpush.msrb.mxu1 %v1334_v26 }
  0x66   :  { %625 = vmatpush.msrb.mxu2 %v1342_v28  ;;  %645 = vmatpush.msrb.mxu3 %v1340_v27 }
  0x67   :  { %586 = vmatpush.msrb.mxu0 %v1351_v30  ;;  %606 = vmatpush.msrb.mxu1 %v1353_v31 }
  0x68   :  { %626 = vmatpush.msrb.mxu2 %v1361_v33  ;;  %646 = vmatpush.msrb.mxu3 %v1359_v32 }
  0x69   :  { %587 = vmatpush.msrb.mxu0 %v1365_v34  ;;  %607 = vmatpush.msrb.mxu1 %v1367_v35 }
  0x6a   :  { %627 = vmatpush.msrb.mxu2 %v1373_v37  ;;  %647 = vmatpush.msrb.mxu3 %v1371_v36 }
  0x6b   :  { %588 = vmatpush.msrb.mxu0 %v1375_v38  ;;  %608 = vmatpush.msrb.mxu1 %v1377_v39 }
  0x6c   :  { %628 = vmatpush.msrb.mxu2 %v1385_v41  ;;  %648 = vmatpush.msrb.mxu3 %v1383_v40 }
  0x6d   :  { %589 = vmatpush.msrb.mxu0 %v1387_v42  ;;  %609 = vmatpush.msrb.mxu1 %v1389_v43 }
  0x6e   :  { %629 = vmatpush.msrb.mxu2 %v1410_v48  ;;  %649 = vmatpush.msrb.mxu3 %v1408_v47 }
  0x6f   :  { %590 = vmatpush.msrb.mxu0 %v1402_v45  ;;  %610 = vmatpush.msrb.mxu1 %v1404_v46 }
  0x70   :  { %630 = vmatpush.msrb.mxu2 %v1420_v51  ;;  %650 = vmatpush.msrb.mxu3 %v1422_v52 }
  0x71   :  { %591 = vmatpush.msrb.mxu0 %v1414_v49  ;;  %611 = vmatpush.msrb.mxu1 %v1416_v50 }
  0x72   :  { %631 = vmatpush.msrb.mxu2 %v1432_v55  ;;  %651 = vmatpush.msrb.mxu3 %v1434_v56 }
  0x73   :  { %592 = vmatpush.msrb.mxu0 %v1426_v53  ;;  %612 = vmatpush.msrb.mxu1 %v1428_v54 }
  0x74   :  { %632 = vmatpush.msrb.mxu2 %v1451_v60  ;;  %652 = vmatpush.msrb.mxu3 %v1453_v61 }
  0x75   :  { %593 = vmatpush.msrb.mxu0 %v1443_v58  ;;  %613 = vmatpush.msrb.mxu1 %v1445_v59 }
  0x76   :  { %633 = vmatpush.msrb.mxu2 %v1463_v0  ;;  %653 = vmatpush.msrb.mxu3 %v1465_v1 }
  0x77   :  { %594 = vmatpush.msrb.mxu0 %v1457_v62  ;;  %614 = vmatpush.msrb.mxu1 %v1459_v63 }
  0x78   :  { %634 = vmatpush.msrb.mxu2 %v1475_v4  ;;  %654 = vmatpush.msrb.mxu3 %v1477_v5 }
  0x79   :  { %595 = vmatpush.msrb.mxu0 %v1469_v2  ;;  %615 = vmatpush.msrb.mxu1 %v1471_v3 }
  0x7a   :  { %635 = vmatpush.msrb.mxu2 %v1494_v9  ;;  %655 = vmatpush.msrb.mxu3 %v1496_v10 }
  0x7b   :  { %596 = vmatpush.msrb.mxu0 %v1488_v7  ;;  %616 = vmatpush.msrb.mxu1 %v1490_v8 }
  0x7c   :  { %636 = vmatpush.msrb.mxu2 %v1506_v13  ;;  %656 = vmatpush.msrb.mxu3 %v1508_v14 }
  0x7d   :  { %597 = vmatpush.msrb.mxu0 %v1500_v11  ;;  %617 = vmatpush.msrb.mxu1 %v1913_v12  ;;  %v71_v11 = vld [vmem:[%s1835_s3] sm:$0xf]  ;;  %s1275_s3 = smov [#allocation7]  }
  0x7e   :  { %637 = vmatpush.msrb.mxu2 %v1518_v29  ;;  %657 = vmatpush.msrb.mxu3 %v1520_v44  ;;  %v73_v14 = vperm.slane %v71_v11, 0  ;;  %v74_v12 = vperm.slane %v71_v11, 1  ;;  %s1030_s10 = sshll.u32 %s1275_s3, 4  ;;  %s1031_s10 = int_to_ptr.vmem [resolvable:$true] %s1030_s10 }
  0x7f   :  { %598 = vmatpush.msrb.mxu0 %v1512_v15  ;;  %618 = vmatpush.msrb.mxu1 %v1514_v16  ;;  %v75_v16 = vperm.slane %v71_v11, 2 }
  0x80   :  { %638 = vmatpush.msrb.mxu2 %v1526_v57  ;;  %658 = vmatpush.msrb.mxu3 %v1528_v6  ;;  %v76_v57 = vperm.slane %v71_v11, 3 }
  0x92   :  { %v114_v8 = vpop.f32.mrf.mxu0  ;;  %v146_v13 = vpop.f32.mrf.mxu1 }
  0x99   :  { %v178_v7 = vpop.f32.mrf.mxu2  ;;  %v210_v29 = vpop.f32.mrf.mxu3 }
  0x9a   :  { %v117_v10 = vpop.f32.mrf.mxu0  ;;  %v149_v44 = vpop.f32.mrf.mxu1 }
  0x9b   :  { %v1665_v9 = vadd.f32 %v117_v10, %v73_v14  ;;  %v1667_v15 = vadd.f32 %v149_v44, %v74_v12 }
  0x9d   :  { %1914 = vst [vmem:[#allocation36_spill] sm:$0xff] %v1665_v9 }
  0x9e   :  { %1915 = vst [vmem:[#allocation37_spill] sm:$0xff] %v1667_v15 }
  0xa1   :  { %v181_v3 = vpop.f32.mrf.mxu2  ;;  %v213_v6 = vpop.f32.mrf.mxu3 }
  0xa2   :  { %v1669_v2 = vadd.f32 %v181_v3, %v75_v16  ;;  %v1671_v5 = vadd.f32 %v213_v6, %v76_v57 }
  0xa3   :  { %v120_v4 = vpop.f32.mrf.mxu0  ;;  %v152_v63 = vpop.f32.mrf.mxu1 }
  0xa4   :  { %1916 = vst [vmem:[#allocation38_spill] sm:$0xff] %v1669_v2  ;;  %v1673_v62 = vadd.f32 %v120_v4, %v73_v14  ;;  %v1675_v1 = vadd.f32 %v152_v63, %v74_v12 }
  0xa5   :  { %1917 = vst [vmem:[#allocation39_spill] sm:$0xff] %v1671_v5 }
  0xa6   :  { %1918 = vst [vmem:[#allocation40_spill] sm:$0xff] %v1673_v62 }
  0xa7   :  { %1919 = vst [vmem:[#allocation41_spill] sm:$0xff] %v1675_v1 }
  0xaa   :  { %v184_v0 = vpop.f32.mrf.mxu2  ;;  %v216_v59 = vpop.f32.mrf.mxu3 }
  0xab   :  { %v1677_v10 = vadd.f32 %v184_v0, %v75_v16  ;;  %v1679_v44 = vadd.f32 %v216_v59, %v76_v57  ;;  %v123_v15 = vpop.f32.mrf.mxu0  ;;  %v155_v11 = vpop.f32.mrf.mxu1  ;;  %v115_v59 = vadd.f32 %v114_v8, %v73_v14 }
  0xac   :  { %v1681_v9 = vadd.f32 %v123_v15, %v73_v14  ;;  %v1683_v3 = vadd.f32 %v155_v11, %v74_v12 }
  0xad   :  { %1920 = vst [vmem:[#allocation42_spill] sm:$0xff] %v1677_v10  ;;  %v147_v10 = vadd.f32 %v146_v13, %v74_v12 }
  0xae   :  { %1921 = vst [vmem:[#allocation43_spill] sm:$0xff] %v1679_v44 }
  0xaf   :  { %1922 = vst [vmem:[#allocation44_spill] sm:$0xff] %v1681_v9 }
  0xb0   :  { %1923 = vst [vmem:[#allocation45_spill] sm:$0xff] %v1683_v3 }
  0xb2   :  { %v187_v6 = vpop.f32.mrf.mxu2  ;;  %v219_v2 = vpop.f32.mrf.mxu3 }
  0xb3   :  { %v1685_v5 = vadd.f32 %v187_v6, %v75_v16  ;;  %v1687_v4 = vadd.f32 %v219_v2, %v76_v57  ;;  %v126_v63 = vpop.f32.mrf.mxu0  ;;  %v158_v1 = vpop.f32.mrf.mxu1 }
  0xb4   :  { %v1689_v62 = vadd.f32 %v126_v63, %v73_v14  ;;  %v1691_v0 = vadd.f32 %v158_v1, %v74_v12  ;;  %v211_v63 = vadd.f32 %v210_v29, %v76_v57 }
  0xb5   :  { %1924 = vst [vmem:[#allocation46_spill] sm:$0xff] %v1685_v5 }
  0xb6   :  { %1925 = vst [vmem:[#allocation47_spill] sm:$0xff] %v1687_v4 }
  0xb7   :  { %1926 = vst [vmem:[#allocation48_spill] sm:$0xff] %v1689_v62 }
  0xb8   :  { %1927 = vst [vmem:[#allocation49_spill] sm:$0xff] %v1691_v0 }
  0xba   :  { %v190_v44 = vpop.f32.mrf.mxu2  ;;  %v222_v58 = vpop.f32.mrf.mxu3 }
  0xbb   :  { %v1693_v15 = vadd.f32 %v190_v44, %v75_v16  ;;  %v1695_v11 = vadd.f32 %v222_v58, %v76_v57  ;;  %v306_v3 = vpop.f32.mrf.mxu0  ;;  %v326_v9 = vpop.f32.mrf.mxu1  ;;  %v179_v44 = vadd.f32 %v178_v7, %v75_v16 }
  0xbc   :  { %v369_v6 = vadd.f32 %v306_v3, %v115_v59  ;;  %v370_v5 = vadd.f32 %v326_v9, %v147_v10 }
  0xbd   :  { %1928 = vst [vmem:[#allocation50_spill] sm:$0xff] %v1693_v15 }
  0xbe   :  { %1929 = vst [vmem:[#allocation51_spill] sm:$0xff] %v1695_v11  ;;  %v1063_v2 = vmul.f32 -1.442695, %v369_v6  ;;  %v1064_v4 = vmul.f32 -1.442695, %v370_v5 }
  0xc0   :  { %1084 = vpow2.f32 %v1063_v2 }
  0xc1   :  { %1086 = vpow2.f32 %v1064_v4 }
  0xc3   :  { %v366_v62 = vpop.f32.mrf.mxu3  ;;  %v346_v58 = vpop.f32.mrf.mxu2 }
  0xc4   :  { %v372_v1 = vadd.f32 %v366_v62, %v211_v63  ;;  %v371_v9 = vadd.f32 %v346_v58, %v179_v44 }
  0xc6   :  { %v1085_v0 = vpop.eup %1084  ;;  %v1065_v8 = vmul.f32 -1.442695, %v372_v1 }
  0xc7   :  { %v1087_v13 = vpop.eup %1086  ;;  %v376_v14 = vadd.f32 1.0, %v1085_v0 }
  0xc8   :  { %v395_v12 = vadd.f32 1.0, %v1087_v13  ;;  %1088 = vpow2.f32 %v1065_v8 }
  0xc9   :  { %1090 = vrcp.f32 %v376_v14  ;;  %v388_v57 = vand.u32 2147483648, %v376_v14  ;;  %v386_v2 = vand.u32 2147483647, %v376_v14  ;;  %vm382_vm3 = vweird.f32 %v376_v14 }
  0xca   :  { %1092 = vrcp.f32 %v395_v12  ;;  %v407_v6 = vand.u32 2147483648, %v395_v12  ;;  %v405_v1 = vand.u32 2147483647, %v395_v12  ;;  %vm401_vm4 = vweird.f32 %v395_v12 }
  0xcb   :  { %vm387_vm6 = vcmp.eq.f32.partialorder %v386_v2, 8.507059e+37 }
  0xcc   :  { %v408_v13 = vor.u32 1.1754944e-38, %v407_v6  ;;  %vm406_vm8 = vcmp.eq.f32.partialorder %v405_v1, 8.507059e+37 }
  0xce   :  { %v1089_v15 = vpop.eup %1088 }
  0xcf   :  { %v1091_v3 = vpop.eup %1090  ;;  %v415_v10 = vadd.f32 1.0, %v1089_v15  ;;  %v389_v15 = vor.u32 1.1754944e-38, %v388_v57 }
  0xd0   :  { %v1093_v5 = vpop.eup %1092  ;;  %v378_v59 = vmul.f32 %v1091_v3, %v376_v14  ;;  %vm383_vm1 = vweird.f32 %v1091_v3 }
  0xd1   :  { %v397_v4 = vmul.f32 %v1093_v5, %v395_v12  ;;  %1094 = vrcp.f32 %v415_v10  ;;  %vm402_vm2 = vweird.f32 %v1093_v5  ;;  %vm384_vm5 = vmor %vm382_vm3, %vm383_vm1  ;;  %v427_v57 = vand.u32 2147483648, %v415_v10 }
  0xd2   :  { %v379_v29 = vsub.f32 1.0, %v378_v59  ;;  %1096 = vtanh.f32 %v371_v9  ;;  %vm403_vm7 = vmor %vm401_vm4, %vm402_vm2  ;;  %vm421_vm10 = vweird.f32 %v415_v10 }
  0xd3   :  { %v398_v62 = vsub.f32 1.0, %v397_v4  ;;  %v428_v2 = vor.u32 1.1754944e-38, %v427_v57  ;;  %v1958_v57 = vld [vmem:[#allocation38_spill] sm:$0xff] }
  0xd4   :  { %v380_v0 = vmul.f32 %v1091_v3, %v379_v29 }
  0xd5   :  { %v399_v63 = vmul.f32 %v1093_v5, %v398_v62 }
  0xd6   :  { %v381_v7 = vadd.f32 %v1091_v3, %v380_v0 }
  0xd7   :  { %v1095_v16 = vpop.eup %1094  ;;  %v400_v8 = vadd.f32 %v1093_v5, %v399_v63 }
  0xd8   :  { %v385_v58 = vsel %vm384_vm5, %v1091_v3, %v381_v7  ;;  %v417_v44 = vmul.f32 %v1095_v16, %v415_v10  ;;  %v1097_v9 = vpop.eup %1096  ;;  %vm422_vm9 = vweird.f32 %v1095_v16  ;;  %v425_v3 = vand.u32 2147483647, %v415_v10 }
  0xd9   :  { %v390_v59 = vsel %vm387_vm6, %v389_v15, %v385_v58  ;;  %v404_v4 = vsel %vm403_vm7, %v1093_v5, %v400_v8  ;;  %vm423_vm11 = vmor %vm421_vm10, %vm422_vm9  ;;  %v1957_v8 = vld [vmem:[#allocation39_spill] sm:$0xff] }
  0xda   :  { %v409_v29 = vsel %vm406_vm8, %v408_v13, %v404_v4  ;;  %v432_v62 = vmul.f32 %v1097_v9, %v390_v59  ;;  %v418_v11 = vsub.f32 1.0, %v417_v44  ;;  %vm426_vm12 = vcmp.eq.f32.partialorder %v425_v3, 8.507059e+37 }
  0xdb   :  { %v431_v61 = vmul.f32 0.0, %v409_v29 }
  0xdc   :  { %v419_v0 = vmul.f32 %v1095_v16, %v418_v11  ;;  %v1956_v11 = vld [vmem:[#allocation37_spill] sm:$0xff] }
  0xdd   :  { %v1697_v14 = vadd.f32 %v432_v62, %v431_v61 }
  0xde   :  { %v420_v12 = vadd.f32 %v1095_v16, %v419_v0 }
  0xdf   :  { %1098 = vtanh.f32 %v1697_v14 }
  0xe0   :  { %v424_v6 = vsel %vm423_vm11, %v1095_v16, %v420_v12 }
  0xe1   :  { %v429_v63 = vsel %vm426_vm12, %v428_v2, %v424_v6 }
  0xe5   :  { %v1099_v5 = vpop.eup %1098 }
  0xe6   :  { %v435_v1 = vmul.f32 %v1099_v5, %v429_v63 }
  0xe8   :  { %452 = vmatmul.f32.vlgmr.msra.gmra.mxu0 %v435_v1  ;;  %472 = vmatmul.f32.vlgmr.msra.gmra.mxu1 %v435_v1 }
  0xe9   :  { %492 = vmatmul.f32.vlgmr.msra.gmra.mxu2 %v435_v1  ;;  %512 = vmatmul.f32.vlgmr.msra.gmra.mxu3 %v435_v1 }
  0xea   :  { %730 = vmatpush.msra.mxu0 %v1310_v17  ;;  %750 = vmatpush.msra.mxu1 %v1312_v18  ;;  %v1930_v17 = vld [vmem:[#allocation13_spill] sm:$0xff]  ;;  %v1931_v18 = vld [vmem:[#allocation11_spill] sm:$0xff] }
  0xeb   :  { %770 = vmatpush.msra.mxu2 %v1318_v20  ;;  %790 = vmatpush.msra.mxu3 %v1316_v19  ;;  %v1932_v19 = vld [vmem:[#allocation12_spill] sm:$0xff] }
  0xec   :  { %731 = vmatpush.msra.mxu0 %v1322_v21  ;;  %751 = vmatpush.msra.mxu1 %v1324_v22  ;;  %v1933_v20 = vld [vmem:[#allocation16_spill] sm:$0xff]  ;;  %v1934_v21 = vld [vmem:[#allocation17_spill] sm:$0xff]  ;;  %v1935_v22 = vld [vmem:[#allocation14_spill] sm:$0xff] }
  0xed   :  { %771 = vmatpush.msra.mxu2 %v1330_v24  ;;  %791 = vmatpush.msra.mxu3 %v1328_v23  ;;  %v1936_v23 = vld [vmem:[#allocation15_spill] sm:$0xff]  ;;  %v1937_v24 = vld [vmem:[#allocation20_spill] sm:$0xff] }
  0xee   :  { %732 = vmatpush.msra.mxu0 %v1332_v25  ;;  %752 = vmatpush.msra.mxu1 %v1334_v26  ;;  %v1938_v25 = vld [vmem:[#allocation21_spill] sm:$0xff]  ;;  %v1939_v26 = vld [vmem:[#allocation18_spill] sm:$0xff] }
  0xef   :  { %772 = vmatpush.msra.mxu2 %v1342_v28  ;;  %792 = vmatpush.msra.mxu3 %v1340_v27  ;;  %v1940_v27 = vld [vmem:[#allocation19_spill] sm:$0xff]  ;;  %v1941_v28 = vld [vmem:[#allocation24_spill] sm:$0xff] }
  0xf0   :  { %733 = vmatpush.msra.mxu0 %v1351_v30  ;;  %753 = vmatpush.msra.mxu1 %v1353_v31  ;;  %v1942_v30 = vld [vmem:[#allocation25_spill] sm:$0xff]  ;;  %v1943_v31 = vld [vmem:[#allocation22_spill] sm:$0xff] }
  0xf1   :  { %773 = vmatpush.msra.mxu2 %v1361_v33  ;;  %793 = vmatpush.msra.mxu3 %v1359_v32  ;;  %v1944_v32 = vld [vmem:[#allocation23_spill] sm:$0xff]  ;;  %v1945_v33 = vld [vmem:[#allocation28_spill] sm:$0xff] }
  0xf2   :  { %734 = vmatpush.msra.mxu0 %v1365_v34  ;;  %754 = vmatpush.msra.mxu1 %v1367_v35  ;;  %v1946_v34 = vld [vmem:[#allocation29_spill] sm:$0xff]  ;;  %v1947_v35 = vld [vmem:[#allocation26_spill] sm:$0xff] }
  0xf3   :  { %774 = vmatpush.msra.mxu2 %v1373_v37  ;;  %794 = vmatpush.msra.mxu3 %v1371_v36  ;;  %v1948_v36 = vld [vmem:[#allocation27_spill] sm:$0xff]  ;;  %v1949_v37 = vld [vmem:[#allocation32_spill] sm:$0xff] }
  0xf4   :  { %735 = vmatpush.msra.mxu0 %v1375_v38  ;;  %755 = vmatpush.msra.mxu1 %v1377_v39  ;;  %v1950_v38 = vld [vmem:[#allocation33_spill] sm:$0xff]  ;;  %v1951_v39 = vld [vmem:[#allocation30_spill] sm:$0xff] }
  0xf5   :  { %775 = vmatpush.msra.mxu2 %v1385_v41  ;;  %795 = vmatpush.msra.mxu3 %v1383_v40  ;;  %v1952_v40 = vld [vmem:[#allocation31_spill] sm:$0xff]  ;;  %v1953_v41 = vld [vmem:[#allocation34_spill] sm:$0xff] }
  0xf6   :  { %736 = vmatpush.msra.mxu0 %v1387_v42  ;;  %756 = vmatpush.msra.mxu1 %v1389_v43  ;;  %v1954_v42 = vld [vmem:[#allocation35_spill] sm:$0xff] }
  0xf7   :  { %776 = vmatpush.msra.mxu2 %v1410_v48  ;;  %796 = vmatpush.msra.mxu3 %v1408_v47 }
  0xf8   :  { %737 = vmatpush.msra.mxu0 %v1402_v45  ;;  %757 = vmatpush.msra.mxu1 %v1404_v46  ;;  %v1955_v46 = vld [vmem:[#allocation36_spill] sm:$0xff] }
  0xf9   :  { %777 = vmatpush.msra.mxu2 %v1420_v51  ;;  %797 = vmatpush.msra.mxu3 %v1422_v52 }
  0xfa   :  { %738 = vmatpush.msra.mxu0 %v1414_v49  ;;  %758 = vmatpush.msra.mxu1 %v1416_v50 }
  0xfb   :  { %778 = vmatpush.msra.mxu2 %v1432_v55  ;;  %798 = vmatpush.msra.mxu3 %v1434_v56 }
  0xfc   :  { %739 = vmatpush.msra.mxu0 %v1426_v53  ;;  %759 = vmatpush.msra.mxu1 %v1428_v54 }
  0xfd   :  { %779 = vmatpush.msra.mxu2 %v1451_v60  ;;  %799 = vmatpush.msra.mxu3 %v1930_v17 }
  0xfe   :  { %740 = vmatpush.msra.mxu0 %v1931_v18  ;;  %760 = vmatpush.msra.mxu1 %v1932_v19 }
  0xff   :  { %780 = vmatpush.msra.mxu2 %v1933_v20  ;;  %800 = vmatpush.msra.mxu3 %v1934_v21 }
 0x100   :  { %741 = vmatpush.msra.mxu0 %v1935_v22  ;;  %761 = vmatpush.msra.mxu1 %v1936_v23 }
 0x101   :  { %781 = vmatpush.msra.mxu2 %v1937_v24  ;;  %801 = vmatpush.msra.mxu3 %v1938_v25 }
 0x102   :  { %742 = vmatpush.msra.mxu0 %v1939_v26  ;;  %762 = vmatpush.msra.mxu1 %v1940_v27 }
 0x103   :  { %782 = vmatpush.msra.mxu2 %v1941_v28  ;;  %802 = vmatpush.msra.mxu3 %v1942_v30 }
 0x104   :  { %743 = vmatpush.msra.mxu0 %v1943_v31  ;;  %763 = vmatpush.msra.mxu1 %v1944_v32 }
 0x105   :  { %783 = vmatpush.msra.mxu2 %v1945_v33  ;;  %803 = vmatpush.msra.mxu3 %v1946_v34 }
 0x106   :  { %744 = vmatpush.msra.mxu0 %v1947_v35  ;;  %764 = vmatpush.msra.mxu1 %v1948_v36 }
 0x107   :  { %784 = vmatpush.msra.mxu2 %v1949_v37  ;;  %804 = vmatpush.msra.mxu3 %v1950_v38 }
 0x108   :  { %745 = vmatpush.msra.mxu0 %v1951_v39  ;;  %765 = vmatpush.msra.mxu1 %v1952_v40 }
 0x109   :  { %785 = vmatpush.msra.mxu2 %v1953_v41  ;;  %805 = vmatpush.msra.mxu3 %v1954_v42 }
 0x165   :  { %v453_v43 = vpop.f32.mrf.mxu0  ;;  %v473_v45 = vpop.f32.mrf.mxu1 }
 0x166   :  { %v516_v61 = vadd.f32 %v453_v43, %v1955_v46  ;;  %v517_v10 = vadd.f32 %v473_v45, %v1956_v11 }
 0x168   :  { %v1066_v7 = vmul.f32 -1.442695, %v516_v61  ;;  %v1067_v16 = vmul.f32 -1.442695, %v517_v10 }
 0x16a   :  { %1100 = vpow2.f32 %v1066_v7 }
 0x16b   :  { %1102 = vpow2.f32 %v1067_v16 }
 0x16c   :  { %v513_v15 = vpop.f32.mrf.mxu3  ;;  %v493_v29 = vpop.f32.mrf.mxu2 }
 0x16d   :  { %v519_v13 = vadd.f32 %v513_v15, %v1957_v8  ;;  %v518_v3 = vadd.f32 %v493_v29, %v1958_v57 }
 0x16f   :  { %v1068_v58 = vmul.f32 -1.442695, %v519_v13 }
 0x170   :  { %v1101_v44 = vpop.eup %1100 }
 0x171   :  { %v1103_v9 = vpop.eup %1102  ;;  %v523_v59 = vadd.f32 1.0, %v1101_v44  ;;  %1104 = vpow2.f32 %v1068_v58 }
 0x172   :  { %v542_v4 = vadd.f32 1.0, %v1103_v9 }
 0x173   :  { %1106 = vrcp.f32 %v523_v59  ;;  %v535_v43 = vand.u32 2147483648, %v523_v59  ;;  %v533_v61 = vand.u32 2147483647, %v523_v59  ;;  %vm529_vm15 = vweird.f32 %v523_v59 }
 0x174   :  { %1108 = vrcp.f32 %v542_v4  ;;  %v554_v45 = vand.u32 2147483648, %v542_v4  ;;  %v552_v10 = vand.u32 2147483647, %v542_v4  ;;  %vm548_vm0 = vweird.f32 %v542_v4 }
 0x175   :  { %v536_v15 = vor.u32 1.1754944e-38, %v535_v43  ;;  %vm534_vm3 = vcmp.eq.f32.partialorder %v533_v61, 8.507059e+37 }
 0x176   :  { %v555_v58 = vor.u32 1.1754944e-38, %v554_v45  ;;  %vm553_vm4 = vcmp.eq.f32.partialorder %v552_v10, 8.507059e+37  ;;  %v1166_v10 = vld [vmem:[#allocation5 + $0x1f0] sm:$0xff] }
 0x177   :  { %v1105_v62 = vpop.eup %1104 }
 0x178   :  { %v562_v0 = vadd.f32 1.0, %v1105_v62 }
 0x179   :  { %v1107_v12 = vpop.eup %1106 }
 0x17a   :  { %v1109_v6 = vpop.eup %1108  ;;  %v525_v2 = vmul.f32 %v1107_v12, %v523_v59  ;;  %1110 = vrcp.f32 %v562_v0  ;;  %vm530_vm13 = vweird.f32 %v1107_v12  ;;  %vm568_vm6 = vweird.f32 %v562_v0 }
 0x17b   :  { %v544_v5 = vmul.f32 %v1109_v6, %v542_v4  ;;  %1112 = vtanh.f32 %v518_v3  ;;  %vm549_vm14 = vweird.f32 %v1109_v6  ;;  %vm531_vm1 = vmor %vm529_vm15, %vm530_vm13 }
 0x17c   :  { %v526_v63 = vsub.f32 1.0, %v525_v2  ;;  %vm550_vm2 = vmor %vm548_vm0, %vm549_vm14 }
 0x17d   :  { %v545_v1 = vsub.f32 1.0, %v544_v5 }
 0x17e   :  { %v527_v46 = vmul.f32 %v1107_v12, %v526_v63 }
 0x17f   :  { %v546_v11 = vmul.f32 %v1109_v6, %v545_v1  ;;  %v574_v1 = vand.u32 2147483648, %v562_v0 }
 0x180   :  { %v1111_v7 = vpop.eup %1110  ;;  %v528_v16 = vadd.f32 %v1107_v12, %v527_v46 }
 0x181   :  { %v547_v8 = vadd.f32 %v1109_v6, %v546_v11  ;;  %v564_v13 = vmul.f32 %v1111_v7, %v562_v0  ;;  %v1113_v9 = vpop.eup %1112  ;;  %vm569_vm5 = vweird.f32 %v1111_v7  ;;  %v575_v45 = vor.u32 1.1754944e-38, %v574_v1  ;;  %v1165_v11 = vld [vmem:[#allocation5 + $0x1e8] sm:$0xff]  ;;  %v1184_v1 = vld [vmem:[#allocation5 + $0x140] sm:$0xff] }
 0x182   :  { %v532_v44 = vsel %vm531_vm1, %v1107_v12, %v528_v16  ;;  %v572_v12 = vand.u32 2147483647, %v562_v0  ;;  %vm570_vm7 = vmor %vm568_vm6, %vm569_vm5  ;;  %v1167_v16 = vld [vmem:[#allocation5 + $0x1f8] sm:$0xff]  ;;  %v1168_v0 = vld [vmem:[#allocation5 + $0x1c0] sm:$0xff] }
 0x183   :  { %v537_v29 = vsel %vm534_vm3, %v536_v15, %v532_v44  ;;  %v551_v62 = vsel %vm550_vm2, %v1109_v6, %v547_v8  ;;  %v565_v57 = vsub.f32 1.0, %v564_v13  ;;  %v1170_v15 = vld [vmem:[#allocation5 + $0x1d0] sm:$0xff]  ;;  %v1171_v8 = vld [vmem:[#allocation5 + $0x1d8] sm:$0xff]  ;;  %v1172_v13 = vld [vmem:[#allocation5 + $0x1a0] sm:$0xff] }
 0x184   :  { %v556_v3 = vsel %vm553_vm4, %v555_v58, %v551_v62  ;;  %v579_v2 = vmul.f32 %v1113_v9, %v537_v29  ;;  %vm573_vm8 = vcmp.eq.f32.partialorder %v572_v12, 8.507059e+37  ;;  %v1173_v58 = vld [vmem:[#allocation5 + $0x1a8] sm:$0xff]  ;;  %v1174_v44 = vld [vmem:[#allocation5 + $0x1b0] sm:$0xff]  ;;  %v1175_v9 = vld [vmem:[#allocation5 + $0x1b8] sm:$0xff] }
 0x185   :  { %v578_v5 = vmul.f32 %v556_v3, %v1697_v14  ;;  %v566_v63 = vmul.f32 %v1111_v7, %v565_v57  ;;  %v1164_v14 = vld [vmem:[#allocation5 + $0x1e0] sm:$0xff]  ;;  %v1177_v62 = vld [vmem:[#allocation5 + $0x188] sm:$0xff]  ;;  %v1178_v57 = vld [vmem:[#allocation5 + $0x190] sm:$0xff] }
 0x186   :  { %v1176_v29 = vld [vmem:[#allocation5 + $0x180] sm:$0xff]  ;;  %v1179_v3 = vld [vmem:[#allocation5 + $0x198] sm:$0xff]  ;;  %v1185_v12 = vld [vmem:[#allocation5 + $0x148] sm:$0xff] }
 0x187   :  { %v1769_v59 = vadd.f32 %v579_v2, %v578_v5  ;;  %v567_v4 = vadd.f32 %v1111_v7, %v566_v63  ;;  %v1180_v2 = vld [vmem:[#allocation5 + $0x160] sm:$0xff]  ;;  %v1181_v5 = vld [vmem:[#allocation5 + $0x168] sm:$0xff]  ;;  %v1182_v63 = vld [vmem:[#allocation5 + $0x170] sm:$0xff] }
 0x189   :  { %1114 = vtanh.f32 %v1769_v59  ;;  %v571_v43 = vsel %vm570_vm7, %v1111_v7, %v567_v4  ;;  %v1169_v7 = vld [vmem:[#allocation5 + $0x1c8] sm:$0xff]  ;;  %v1183_v4 = vld [vmem:[#allocation5 + $0x178] sm:$0xff] }
 0x18a   :  { %v576_v46 = vsel %vm573_vm8, %v575_v45, %v571_v43  ;;  %v1186_v43 = vld [vmem:[#allocation5 + $0x150] sm:$0xff]  ;;  %v1187_v45 = vld [vmem:[#allocation5 + $0x158] sm:$0xff] }
 0x18f   :  { %v1115_v6 = vpop.eup %1114 }
 0x190   :  { %v582_v61 = vmul.f32 %v1115_v6, %v576_v46  ;;  %v1188_v6 = vld [vmem:[#allocation5 + $0x120] sm:$0xff]  ;;  %v1189_v46 = vld [vmem:[#allocation5 + $0x128] sm:$0xff] }
 0x192   :  { %599 = vmatmul.f32.vlgmr.msrb.gmra.mxu0 %v582_v61  ;;  %619 = vmatmul.f32.vlgmr.msrb.gmra.mxu1 %v582_v61 }
 0x193   :  { %639 = vmatmul.f32.vlgmr.msrb.gmra.mxu2 %v582_v61  ;;  %659 = vmatmul.f32.vlgmr.msrb.gmra.mxu3 %v582_v61  ;;  %v1190_v61 = vld [vmem:[#allocation5 + $0x100] sm:$0xff] }
 0x194   :  { %877 = vmatpush.msrb.mxu0 %v1164_v14  ;;  %897 = vmatpush.msrb.mxu1 %v1165_v11  ;;  %v1191_v14 = vld [vmem:[#allocation5 + $0x108] sm:$0xff] }
 0x195   :  { %917 = vmatpush.msrb.mxu2 %v1166_v10  ;;  %937 = vmatpush.msrb.mxu3 %v1167_v16 }
 0x196   :  { %878 = vmatpush.msrb.mxu0 %v1168_v0  ;;  %898 = vmatpush.msrb.mxu1 %v1169_v7 }
 0x197   :  { %918 = vmatpush.msrb.mxu2 %v1170_v15  ;;  %938 = vmatpush.msrb.mxu3 %v1171_v8 }
 0x198   :  { %879 = vmatpush.msrb.mxu0 %v1172_v13  ;;  %899 = vmatpush.msrb.mxu1 %v1173_v58 }
 0x199   :  { %919 = vmatpush.msrb.mxu2 %v1174_v44  ;;  %939 = vmatpush.msrb.mxu3 %v1175_v9 }
 0x19a   :  { %880 = vmatpush.msrb.mxu0 %v1176_v29  ;;  %900 = vmatpush.msrb.mxu1 %v1177_v62 }
 0x19b   :  { %920 = vmatpush.msrb.mxu2 %v1178_v57  ;;  %940 = vmatpush.msrb.mxu3 %v1179_v3 }
 0x19c   :  { %881 = vmatpush.msrb.mxu0 %v1180_v2  ;;  %901 = vmatpush.msrb.mxu1 %v1181_v5 }
 0x19d   :  { %921 = vmatpush.msrb.mxu2 %v1182_v63  ;;  %941 = vmatpush.msrb.mxu3 %v1183_v4 }
 0x19e   :  { %882 = vmatpush.msrb.mxu0 %v1184_v1  ;;  %902 = vmatpush.msrb.mxu1 %v1185_v12 }
 0x19f   :  { %922 = vmatpush.msrb.mxu2 %v1186_v43  ;;  %942 = vmatpush.msrb.mxu3 %v1187_v45  ;;  %v1963_v45 = vld [vmem:[#allocation44_spill] sm:$0xff] }
 0x1a0   :  { %883 = vmatpush.msrb.mxu0 %v1188_v6  ;;  %903 = vmatpush.msrb.mxu1 %v1189_v46  ;;  %v1964_v46 = vld [vmem:[#allocation45_spill] sm:$0xff] }
 0x1a1   :  { %923 = vmatpush.msrb.mxu2 %v1410_v48  ;;  %943 = vmatpush.msrb.mxu3 %v1408_v47 }
 0x1a2   :  { %884 = vmatpush.msrb.mxu0 %v1190_v61  ;;  %904 = vmatpush.msrb.mxu1 %v1191_v14 }
 0x1a3   :  { %924 = vmatpush.msrb.mxu2 %v1420_v51  ;;  %944 = vmatpush.msrb.mxu3 %v1422_v52  ;;  %v1960_v51 = vld [vmem:[#allocation41_spill] sm:$0xff] }
 0x1a4   :  { %885 = vmatpush.msrb.mxu0 %v1414_v49  ;;  %905 = vmatpush.msrb.mxu1 %v1416_v50  ;;  %v1959_v49 = vld [vmem:[#allocation40_spill] sm:$0xff] }
 0x1a5   :  { %925 = vmatpush.msrb.mxu2 %v1432_v55  ;;  %945 = vmatpush.msrb.mxu3 %v1434_v56  ;;  %v1961_v56 = vld [vmem:[#allocation43_spill] sm:$0xff] }
 0x1a6   :  { %886 = vmatpush.msrb.mxu0 %v1426_v53  ;;  %906 = vmatpush.msrb.mxu1 %v1428_v54 }
 0x1a7   :  { %926 = vmatpush.msrb.mxu2 %v1451_v60  ;;  %946 = vmatpush.msrb.mxu3 %v1930_v17 }
 0x1a8   :  { %887 = vmatpush.msrb.mxu0 %v1931_v18  ;;  %907 = vmatpush.msrb.mxu1 %v1932_v19 }
 0x1a9   :  { %927 = vmatpush.msrb.mxu2 %v1933_v20  ;;  %947 = vmatpush.msrb.mxu3 %v1934_v21 }
 0x1aa   :  { %888 = vmatpush.msrb.mxu0 %v1935_v22  ;;  %908 = vmatpush.msrb.mxu1 %v1936_v23 }
 0x1ab   :  { %928 = vmatpush.msrb.mxu2 %v1937_v24  ;;  %948 = vmatpush.msrb.mxu3 %v1938_v25 }
 0x1ac   :  { %889 = vmatpush.msrb.mxu0 %v1939_v26  ;;  %909 = vmatpush.msrb.mxu1 %v1940_v27  ;;  %v1962_v26 = vld [vmem:[#allocation42_spill] sm:$0xff] }
 0x1ad   :  { %929 = vmatpush.msrb.mxu2 %v1941_v28  ;;  %949 = vmatpush.msrb.mxu3 %v1942_v30 }
 0x1ae   :  { %890 = vmatpush.msrb.mxu0 %v1943_v31  ;;  %910 = vmatpush.msrb.mxu1 %v1944_v32 }
 0x1af   :  { %930 = vmatpush.msrb.mxu2 %v1945_v33  ;;  %950 = vmatpush.msrb.mxu3 %v1946_v34 }
 0x1b0   :  { %891 = vmatpush.msrb.mxu0 %v1947_v35  ;;  %911 = vmatpush.msrb.mxu1 %v1948_v36 }
 0x1b1   :  { %931 = vmatpush.msrb.mxu2 %v1949_v37  ;;  %951 = vmatpush.msrb.mxu3 %v1950_v38 }
 0x1b2   :  { %892 = vmatpush.msrb.mxu0 %v1951_v39  ;;  %912 = vmatpush.msrb.mxu1 %v1952_v40 }
 0x1b3   :  { %932 = vmatpush.msrb.mxu2 %v1953_v41  ;;  %952 = vmatpush.msrb.mxu3 %v1954_v42 }
 0x20f   :  { %v600_v47 = vpop.f32.mrf.mxu0  ;;  %v620_v48 = vpop.f32.mrf.mxu1 }
 0x210   :  { %v663_v50 = vadd.f32 %v600_v47, %v1959_v49  ;;  %v664_v52 = vadd.f32 %v620_v48, %v1960_v51  ;;  %v1965_v49 = vld [vmem:[#allocation47_spill] sm:$0xff] }
 0x212   :  { %v1069_v53 = vmul.f32 -1.442695, %v663_v50  ;;  %v1070_v54 = vmul.f32 -1.442695, %v664_v52 }
 0x214   :  { %1116 = vpow2.f32 %v1069_v53 }
 0x215   :  { %1118 = vpow2.f32 %v1070_v54 }
 0x216   :  { %v660_v55 = vpop.f32.mrf.mxu3  ;;  %v640_v22 = vpop.f32.mrf.mxu2 }
 0x217   :  { %v666_v60 = vadd.f32 %v660_v55, %v1961_v56  ;;  %v665_v27 = vadd.f32 %v640_v22, %v1962_v26 }
 0x219   :  { %v1071_v17 = vmul.f32 -1.442695, %v666_v60 }
 0x21a   :  { %v1117_v18 = vpop.eup %1116 }
 0x21b   :  { %v1119_v19 = vpop.eup %1118  ;;  %v670_v20 = vadd.f32 1.0, %v1117_v18  ;;  %1120 = vpow2.f32 %v1071_v17 }
 0x21c   :  { %v689_v21 = vadd.f32 1.0, %v1119_v19  ;;  %v1966_v19 = vld [vmem:[#allocation46_spill] sm:$0xff] }
 0x21d   :  { %1122 = vrcp.f32 %v670_v20  ;;  %v682_v34 = vand.u32 2147483648, %v670_v20  ;;  %v680_v37 = vand.u32 2147483647, %v670_v20  ;;  %vm676_vm11 = vweird.f32 %v670_v20 }
 0x21e   :  { %1124 = vrcp.f32 %v689_v21  ;;  %v701_v35 = vand.u32 2147483648, %v689_v21  ;;  %v699_v39 = vand.u32 2147483647, %v689_v21  ;;  %vm695_vm12 = vweird.f32 %v689_v21 }
 0x21f   :  { %v683_v42 = vor.u32 1.1754944e-38, %v682_v34  ;;  %vm681_vm15 = vcmp.eq.f32.partialorder %v680_v37, 8.507059e+37 }
 0x220   :  { %v702_v16 = vor.u32 1.1754944e-38, %v701_v35  ;;  %vm700_vm0 = vcmp.eq.f32.partialorder %v699_v39, 8.507059e+37 }
 0x221   :  { %v1121_v23 = vpop.eup %1120 }
 0x222   :  { %v709_v24 = vadd.f32 1.0, %v1121_v23 }
 0x223   :  { %v1123_v25 = vpop.eup %1122 }
 0x224   :  { %v1125_v28 = vpop.eup %1124  ;;  %v672_v30 = vmul.f32 %v1123_v25, %v670_v20  ;;  %1126 = vrcp.f32 %v709_v24  ;;  %vm677_vm9 = vweird.f32 %v1123_v25  ;;  %v721_v3 = vand.u32 2147483648, %v709_v24 }
 0x225   :  { %v691_v31 = vmul.f32 %v1125_v28, %v689_v21  ;;  %1128 = vtanh.f32 %v665_v27  ;;  %vm696_vm10 = vweird.f32 %v1125_v28  ;;  %vm678_vm13 = vmor %vm676_vm11, %vm677_vm9  ;;  %vm715_vm2 = vweird.f32 %v709_v24 }
 0x226   :  { %v673_v32 = vsub.f32 1.0, %v672_v30  ;;  %vm697_vm14 = vmor %vm695_vm12, %vm696_vm10  ;;  %v719_v2 = vand.u32 2147483647, %v709_v24  ;;  %v722_v63 = vor.u32 1.1754944e-38, %v721_v3 }
 0x227   :  { %v692_v33 = vsub.f32 1.0, %v691_v31 }
 0x228   :  { %v674_v36 = vmul.f32 %v1123_v25, %v673_v32  ;;  %vm720_vm4 = vcmp.eq.f32.partialorder %v719_v2, 8.507059e+37 }
 0x229   :  { %v693_v38 = vmul.f32 %v1125_v28, %v692_v33 }
 0x22a   :  { %v1127_v40 = vpop.eup %1126  ;;  %v675_v41 = vadd.f32 %v1123_v25, %v674_v36 }
 0x22b   :  { %v694_v11 = vadd.f32 %v1125_v28, %v693_v38  ;;  %v711_v10 = vmul.f32 %v1127_v40, %v709_v24  ;;  %v1129_v7 = vpop.eup %1128  ;;  %vm716_vm1 = vweird.f32 %v1127_v40 }
 0x22c   :  { %v679_v0 = vsel %vm678_vm13, %v1123_v25, %v675_v41  ;;  %vm717_vm3 = vmor %vm715_vm2, %vm716_vm1 }
 0x22d   :  { %v684_v15 = vsel %vm681_vm15, %v683_v42, %v679_v0  ;;  %v698_v8 = vsel %vm697_vm14, %v1125_v28, %v694_v11  ;;  %v712_v13 = vsub.f32 1.0, %v711_v10 }
 0x22e   :  { %v703_v58 = vsel %vm700_vm0, %v702_v16, %v698_v8  ;;  %v726_v44 = vmul.f32 %v1129_v7, %v684_v15 }
 0x22f   :  { %v725_v9 = vmul.f32 %v703_v58, %v1769_v59  ;;  %v713_v29 = vmul.f32 %v1127_v40, %v712_v13 }
 0x231   :  { %v1813_v62 = vadd.f32 %v726_v44, %v725_v9  ;;  %v714_v57 = vadd.f32 %v1127_v40, %v713_v29 }
 0x233   :  { %1130 = vtanh.f32 %v1813_v62  ;;  %v718_v5 = vsel %vm717_vm3, %v1127_v40, %v714_v57 }
 0x234   :  { %v723_v1 = vsel %vm720_vm4, %v722_v63, %v718_v5  ;;  %v1967_v5 = vld [vmem:[#allocation48_spill] sm:$0xff] }
 0x239   :  { %v1131_v4 = vpop.eup %1130 }
 0x23a   :  { %v729_v12 = vmul.f32 %v1131_v4, %v723_v1  ;;  %v1968_v4 = vld [vmem:[#allocation49_spill] sm:$0xff] }
 0x23c   :  { %746 = vmatmul.f32.vlgmr.msra.gmra.mxu0 %v729_v12  ;;  %766 = vmatmul.f32.vlgmr.msra.gmra.mxu1 %v729_v12 }
 0x23d   :  { %786 = vmatmul.f32.vlgmr.msra.gmra.mxu2 %v729_v12  ;;  %806 = vmatmul.f32.vlgmr.msra.gmra.mxu3 %v729_v12 }
 0x2b9   :  { %v747_v59 = vpop.f32.mrf.mxu0  ;;  %v767_v43 = vpop.f32.mrf.mxu1 }
 0x2ba   :  { %v810_v6 = vadd.f32 %v747_v59, %v1963_v45  ;;  %v811_v61 = vadd.f32 %v767_v43, %v1964_v46  ;;  %v1969_v45 = vld [vmem:[#allocation51_spill] sm:$0xff] }
 0x2bc   :  { %v1072_v14 = vmul.f32 -1.442695, %v810_v6  ;;  %v1073_v47 = vmul.f32 -1.442695, %v811_v61 }
 0x2be   :  { %1132 = vpow2.f32 %v1072_v14 }
 0x2bf   :  { %1134 = vpow2.f32 %v1073_v47 }
 0x2c0   :  { %v807_v48 = vpop.f32.mrf.mxu3  ;;  %v787_v56 = vpop.f32.mrf.mxu2 }
 0x2c1   :  { %v813_v50 = vadd.f32 %v807_v48, %v1965_v49  ;;  %v812_v20 = vadd.f32 %v787_v56, %v1966_v19 }
 0x2c3   :  { %v1074_v51 = vmul.f32 -1.442695, %v813_v50 }
 0x2c4   :  { %v1133_v52 = vpop.eup %1132 }
 0x2c5   :  { %v1135_v53 = vpop.eup %1134  ;;  %v817_v54 = vadd.f32 1.0, %v1133_v52  ;;  %1136 = vpow2.f32 %v1074_v51 }
 0x2c6   :  { %v836_v55 = vadd.f32 1.0, %v1135_v53  ;;  %v1970_v53 = vld [vmem:[#allocation50_spill] sm:$0xff] }
 0x2c7   :  { %1138 = vrcp.f32 %v817_v54  ;;  %v829_v26 = vand.u32 2147483648, %v817_v54  ;;  %v827_v30 = vand.u32 2147483647, %v817_v54  ;;  %vm823_vm7 = vweird.f32 %v817_v54 }
 0x2c8   :  { %1140 = vrcp.f32 %v836_v55  ;;  %v848_v27 = vand.u32 2147483648, %v836_v55  ;;  %v846_v32 = vand.u32 2147483647, %v836_v55  ;;  %vm842_vm8 = vweird.f32 %v836_v55 }
 0x2c9   :  { %v830_v35 = vor.u32 1.1754944e-38, %v829_v26  ;;  %vm828_vm11 = vcmp.eq.f32.partialorder %v827_v30, 8.507059e+37 }
 0x2ca   :  { %v849_v38 = vor.u32 1.1754944e-38, %v848_v27  ;;  %vm847_vm12 = vcmp.eq.f32.partialorder %v846_v32, 8.507059e+37 }
 0x2cb   :  { %v1137_v60 = vpop.eup %1136 }
 0x2cc   :  { %v856_v17 = vadd.f32 1.0, %v1137_v60 }
 0x2cd   :  { %v1139_v18 = vpop.eup %1138 }
 0x2ce   :  { %v1141_v21 = vpop.eup %1140  ;;  %v819_v22 = vmul.f32 %v1139_v18, %v817_v54  ;;  %1142 = vrcp.f32 %v856_v17  ;;  %vm824_vm5 = vweird.f32 %v1139_v18  ;;  %v868_v13 = vand.u32 2147483648, %v856_v17 }
 0x2cf   :  { %v838_v23 = vmul.f32 %v1141_v21, %v836_v55  ;;  %1144 = vtanh.f32 %v812_v20  ;;  %vm843_vm6 = vweird.f32 %v1141_v21  ;;  %vm825_vm9 = vmor %vm823_vm7, %vm824_vm5  ;;  %vm862_vm14 = vweird.f32 %v856_v17 }
 0x2d0   :  { %v820_v24 = vsub.f32 1.0, %v819_v22  ;;  %vm844_vm10 = vmor %vm842_vm8, %vm843_vm6  ;;  %v866_v58 = vand.u32 2147483647, %v856_v17  ;;  %v869_v9 = vor.u32 1.1754944e-38, %v868_v13 }
 0x2d1   :  { %v839_v25 = vsub.f32 1.0, %v838_v23 }
 0x2d2   :  { %v821_v28 = vmul.f32 %v1139_v18, %v820_v24  ;;  %vm867_vm0 = vcmp.eq.f32.partialorder %v866_v58, 8.507059e+37 }
 0x2d3   :  { %v840_v31 = vmul.f32 %v1141_v21, %v839_v25 }
 0x2d4   :  { %v1143_v33 = vpop.eup %1142  ;;  %v822_v34 = vadd.f32 %v1139_v18, %v821_v28 }
 0x2d5   :  { %v841_v36 = vadd.f32 %v1141_v21, %v840_v31  ;;  %v858_v37 = vmul.f32 %v1143_v33, %v856_v17  ;;  %v1145_v40 = vpop.eup %1144  ;;  %vm863_vm13 = vweird.f32 %v1143_v33 }
 0x2d6   :  { %v826_v39 = vsel %vm825_vm9, %v1139_v18, %v822_v34  ;;  %vm864_vm15 = vmor %vm862_vm14, %vm863_vm13 }
 0x2d7   :  { %v831_v41 = vsel %vm828_vm11, %v830_v35, %v826_v39  ;;  %v845_v42 = vsel %vm844_vm10, %v1141_v21, %v841_v36  ;;  %v859_v11 = vsub.f32 1.0, %v858_v37 }
 0x2d8   :  { %v850_v10 = vsel %vm847_vm12, %v849_v38, %v845_v42  ;;  %v873_v16 = vmul.f32 %v1145_v40, %v831_v41 }
 0x2d9   :  { %v872_v0 = vmul.f32 %v850_v10, %v1813_v62  ;;  %v860_v7 = vmul.f32 %v1143_v33, %v859_v11 }
 0x2db   :  { %v1821_v15 = vadd.f32 %v873_v16, %v872_v0  ;;  %v861_v8 = vadd.f32 %v1143_v33, %v860_v7 }
 0x2dd   :  { %1146 = vtanh.f32 %v1821_v15  ;;  %v865_v44 = vsel %vm864_vm15, %v1143_v33, %v861_v8 }
 0x2de   :  { %v870_v57 = vsel %vm867_vm0, %v869_v9, %v865_v44 }
 0x2e3   :  { %v1147_v29 = vpop.eup %1146 }
 0x2e4   :  { %v876_v3 = vmul.f32 %v1147_v29, %v870_v57 }
 0x2e6   :  { %893 = vmatmul.f32.vlgmr.msrb.gmra.mxu0 %v876_v3  ;;  %913 = vmatmul.f32.vlgmr.msrb.gmra.mxu1 %v876_v3 }
 0x2e7   :  { %933 = vmatmul.f32.vlgmr.msrb.gmra.mxu2 %v876_v3  ;;  %953 = vmatmul.f32.vlgmr.msrb.gmra.mxu3 %v876_v3 }
 0x363   :  { %v894_v62 = vpop.f32.mrf.mxu0  ;;  %v914_v2 = vpop.f32.mrf.mxu1 }
 0x364   :  { %v957_v63 = vadd.f32 %v894_v62, %v1967_v5  ;;  %v958_v1 = vadd.f32 %v914_v2, %v1968_v4 }
 0x366   :  { %v1075_v12 = vmul.f32 -1.442695, %v957_v63  ;;  %v1076_v59 = vmul.f32 -1.442695, %v958_v1 }
 0x368   :  { %1148 = vpow2.f32 %v1075_v12 }
 0x369   :  { %1150 = vpow2.f32 %v1076_v59 }
 0x36a   :  { %v954_v43 = vpop.f32.mrf.mxu3  ;;  %v934_v49 = vpop.f32.mrf.mxu2 }
 0x36b   :  { %v960_v6 = vadd.f32 %v954_v43, %v1969_v45  ;;  %v959_v54 = vadd.f32 %v934_v49, %v1970_v53 }
 0x36d   :  { %v1077_v46 = vmul.f32 -1.442695, %v960_v6 }
 0x36e   :  { %v1149_v61 = vpop.eup %1148 }
 0x36f   :  { %v1151_v14 = vpop.eup %1150  ;;  %v964_v47 = vadd.f32 1.0, %v1149_v61  ;;  %1152 = vpow2.f32 %v1077_v46 }
 0x370   :  { %v983_v48 = vadd.f32 1.0, %v1151_v14 }
 0x371   :  { %1154 = vrcp.f32 %v964_v47  ;;  %v976_v19 = vand.u32 2147483648, %v964_v47  ;;  %v974_v22 = vand.u32 2147483647, %v964_v47  ;;  %vm970_vm3 = vweird.f32 %v964_v47 }
 0x372   :  { %1156 = vrcp.f32 %v983_v48  ;;  %v995_v20 = vand.u32 2147483648, %v983_v48  ;;  %v993_v24 = vand.u32 2147483647, %v983_v48  ;;  %vm989_vm4 = vweird.f32 %v983_v48 }
 0x373   :  { %v977_v27 = vor.u32 1.1754944e-38, %v976_v19  ;;  %vm975_vm7 = vcmp.eq.f32.partialorder %v974_v22, 8.507059e+37 }
 0x374   :  { %v996_v31 = vor.u32 1.1754944e-38, %v995_v20  ;;  %vm994_vm8 = vcmp.eq.f32.partialorder %v993_v24, 8.507059e+37 }
 0x375   :  { %v1153_v50 = vpop.eup %1152 }
 0x376   :  { %v1003_v51 = vadd.f32 1.0, %v1153_v50 }
 0x377   :  { %v1155_v52 = vpop.eup %1154 }
 0x378   :  { %v1157_v55 = vpop.eup %1156  ;;  %v966_v56 = vmul.f32 %v1155_v52, %v964_v47  ;;  %1158 = vrcp.f32 %v1003_v51  ;;  %vm971_vm1 = vweird.f32 %v1155_v52  ;;  %v1015_v11 = vand.u32 2147483648, %v1003_v51 }
 0x379   :  { %v985_v60 = vmul.f32 %v1157_v55, %v983_v48  ;;  %1160 = vtanh.f32 %v959_v54  ;;  %vm990_vm2 = vweird.f32 %v1157_v55  ;;  %vm972_vm5 = vmor %vm970_vm3, %vm971_vm1  ;;  %vm1009_vm10 = vweird.f32 %v1003_v51 }
 0x37a   :  { %v967_v17 = vsub.f32 1.0, %v966_v56  ;;  %vm991_vm6 = vmor %vm989_vm4, %vm990_vm2  ;;  %v1013_v10 = vand.u32 2147483647, %v1003_v51  ;;  %v1016_v0 = vor.u32 1.1754944e-38, %v1015_v11 }
 0x37b   :  { %v986_v18 = vsub.f32 1.0, %v985_v60 }
 0x37c   :  { %v968_v21 = vmul.f32 %v1155_v52, %v967_v17  ;;  %vm1014_vm12 = vcmp.eq.f32.partialorder %v1013_v10, 8.507059e+37 }
 0x37d   :  { %v987_v23 = vmul.f32 %v1157_v55, %v986_v18 }
 0x37e   :  { %v1159_v25 = vpop.eup %1158  ;;  %v969_v26 = vadd.f32 %v1155_v52, %v968_v21 }
 0x37f   :  { %v988_v28 = vadd.f32 %v1157_v55, %v987_v23  ;;  %v1005_v30 = vmul.f32 %v1159_v25, %v1003_v51  ;;  %v1161_v33 = vpop.eup %1160  ;;  %vm1010_vm9 = vweird.f32 %v1159_v25 }
 0x380   :  { %v973_v32 = vsel %vm972_vm5, %v1155_v52, %v969_v26  ;;  %vm1011_vm11 = vmor %vm1009_vm10, %vm1010_vm9 }
 0x381   :  { %v978_v34 = vsel %vm975_vm7, %v977_v27, %v973_v32  ;;  %v992_v35 = vsel %vm991_vm6, %v1157_v55, %v988_v28  ;;  %v1006_v36 = vsub.f32 1.0, %v1005_v30 }
 0x382   :  { %v997_v37 = vsel %vm994_vm8, %v996_v31, %v992_v35  ;;  %v1020_v38 = vmul.f32 %v1161_v33, %v978_v34 }
 0x383   :  { %v1019_v39 = vmul.f32 %v997_v37, %v1821_v15  ;;  %v1007_v40 = vmul.f32 %v1159_v25, %v1006_v36 }
 0x385   :  { %v1021_v41 = vadd.f32 %v1020_v38, %v1019_v39  ;;  %v1008_v42 = vadd.f32 %v1159_v25, %v1007_v40 }
 0x387   :  { %1162 = vtanh.f32 %v1021_v41  ;;  %v1012_v16 = vsel %vm1011_vm11, %v1159_v25, %v1008_v42 }
 0x388   :  { %v1017_v15 = vsel %vm1014_vm12, %v1016_v0, %v1012_v16 }
 0x38d   :  { %v1163_v7 = vpop.eup %1162 }
 0x38e   :  { %v1023_v8 = vmul.f32 %v1163_v7, %v1017_v15 }
 0x390   :  { %1024 = vst [vmem:[#allocation7] sm:$0xff] %v1023_v8 }
 0x391   :  { %1035 = dma.vmem_to_hbm [thread:$0]  %s1031_s10, 128, %s1033_s13, [#allocation4]  }
 0x392   :  { %1268 = dma.done.wait [#allocation4], 128  }
 0x393   :  { %1269 = vsyncadd [#allocation4], 4294967168 }
 0x394   :  { %1040 = vsyncpa [#allocation3], 1 }
 0x395   :  { %1041 = vsyncpa [#allocation6], 1 }
 0x396   :  { %1042 = vsyncpa [#allocation4], 1 }

</bundles_post_ra>
